<compile_context>
chip_gen: v6e
topology: v6e:2x2x1
jax: 0.10.0
libtpu: 0.0.40
codegen_flags: <defaults>
</compile_context>

<pallas_src>
import functools

import jax
import jax.numpy as jnp
from jax import lax
from jax.experimental import pallas as pl
from jax.experimental.pallas import tpu as pltpu


# ----------------------------------------------------------------------------
# Pallas kernels
# ----------------------------------------------------------------------------
def input_proj_kernel(x_ref, w_ref, b_ref, gx_ref):
    """Hoisted layer-1 input projection over a tile of time-major rows.

    x_ref : (rt, F)   f32 rows in TIME-MAJOR order (row = t*B + b)
    w_ref : (F, 4H)   bf16, gate order [i, f, o, g]
    b_ref : (1, 4H)   f32 combined bias (b_ih1 + b_hh1), same gate order
    gx_ref: (rt, 4H)  bf16 output block
    """
    x = x_ref[...].astype(w_ref.dtype)
    gx = jnp.dot(x, w_ref[...], preferred_element_type=jnp.float32) + b_ref[...]
    gx_ref[...] = gx.astype(gx_ref.dtype)


def fused_lstm_fc_kernel(gx_ref, whh1_ref, w2_ref, b2_ref, fcw_ref, fcb_ref,
                         out_ref, h1_sc, c1_sc, h2_sc, c2_sc,
                         *, hidden, t_chunk):
    """Both LSTM layers + Linear(H,1), recurrent over time chunks.

    grid = (batch_tiles, time_chunks); axis 1 is the sequential recurrence.

    gx_ref  : (t_chunk, Bt, 4H) bf16  precomputed x@W_ih1 + bias1 (time-major)
    whh1_ref: (H, 4H)  bf16           layer-1 hidden->gates
    w2_ref  : (2H, 4H) bf16           fused [W_ih2 ; W_hh2]
    b2_ref  : (1, 4H)  f32            layer-2 combined bias
    fcw_ref : (1, H)   f32            fc weight row (VPU multiply + lane reduce)
    fcb_ref : (1, 1)   f32            fc bias
    out_ref : (Bt, 1)  f32            final model output (written once)
    h*_sc/c*_sc : (Bt, H) f32 VMEM scratch, persist across time chunks
    """
    H = hidden
    c_idx = pl.program_id(1)

    @pl.when(c_idx == 0)
    def _init():
        h1_sc[...] = jnp.zeros_like(h1_sc)
        c1_sc[...] = jnp.zeros_like(c1_sc)
        h2_sc[...] = jnp.zeros_like(h2_sc)
        c2_sc[...] = jnp.zeros_like(c2_sc)

    whh1 = whh1_ref[...]
    w2 = w2_ref[...]
    b2 = b2_ref[...]
    cdt = whh1.dtype                      # bf16 MXU input dtype

    def cell(gates, c_prev):
        # gate order [i, f, o, g]: one wide sigmoid over 3H lanes, tanh on rest.
        s = jax.nn.sigmoid(gates[:, : 3 * H])
        i_g = s[:, 0 * H:1 * H]
        f_g = s[:, 1 * H:2 * H]
        o_g = s[:, 2 * H:3 * H]
        g_g = jnp.tanh(gates[:, 3 * H:4 * H])
        c_new = f_g * c_prev + i_g * g_g
        h_new = o_g * jnp.tanh(c_new)
        return h_new, c_new

    def step(i, carry):
        h1, c1, h2, c2 = carry
        # Leading-axis dynamic slice of the time-major block: a whole (Bt, 4H)
        # slab, no cross-sublane gather.
        gx_t = gx_ref[i].astype(jnp.float32)
        g1 = gx_t + jnp.dot(h1.astype(cdt), whh1,
                            preferred_element_type=jnp.float32)
        h1, c1 = cell(g1, c1)
        # Fused layer-2 matmul: [h1 | h2] @ [W_ih2 ; W_hh2]  (one MXU push).
        h12 = jnp.concatenate([h1, h2], axis=-1).astype(cdt)
        g2 = jnp.dot(h12, w2, preferred_element_type=jnp.float32) + b2
        h2, c2 = cell(g2, c2)
        return h1, c1, h2, c2

    carry0 = (h1_sc[...], c1_sc[...], h2_sc[...], c2_sc[...])
    h1, c1, h2, c2 = lax.fori_loop(0, t_chunk, step, carry0, unroll=True)

    h1_sc[...] = h1
    c1_sc[...] = c1
    h2_sc[...] = h2
    c2_sc[...] = c2

    # Only the last hidden state feeds the head: fuse Linear(H,1) as a VPU
    # multiply + lane reduce; only (B, 1) is ever written back to HBM.
    @pl.when(c_idx == pl.num_programs(1) - 1)
    def _fc():
        y = jnp.sum(h2 * fcw_ref[...], axis=-1, keepdims=True) + fcb_ref[...]
        out_ref[...] = y.astype(out_ref.dtype)


# ----------------------------------------------------------------------------
# Tiling / VMEM budgeting
# ----------------------------------------------------------------------------
def _round_up(x, m):
    return ((x + m - 1) // m) * m


def _choose_tiles(B, T, H, budget_bytes):
    """VMEM-budget-driven (b_tile, t_chunk) for the fused recurrence."""
    # Single-buffered resident weights (bf16) + biases/fc head (f32).
    w_bytes = (H * 4 * H + 2 * H * 4 * H) * 2 + (4 * H + H + 1) * 4

    def usage(bt, tc):
        gx_blk = 2 * tc * bt * 4 * H * 2      # double-buffered bf16 GX block
        state = 4 * bt * H * 4                # persistent h/c scratch (f32)
        return w_bytes + gx_blk + state

    # Batch tile: split across the two v7x TensorCores when B allows, keep the
    # MXU M dimension as large as the budget permits, multiple of 8 sublanes.
    if B <= 8:
        b_tile = B
    else:
        b_tile = min(_round_up(-(-B // 2), 8), 256)

    cands = ([T] if T <= 32 else []) + [32, 16, 8, 4, 2]

    def pick_tc(bt):
        for tc in cands:
            if T % tc == 0 and usage(bt, tc) <= budget_bytes:
                return tc
        return 1

    t_chunk = pick_tc(b_tile)
    while b_tile > 8 and usage(b_tile, t_chunk) > budget_bytes:
        b_tile = max(8, _round_up(b_tile // 2, 8))
        t_chunk = pick_tc(b_tile)
    # TODO(synk): for H >~ 1500 the resident weights alone exceed the budget;
    # add an inner tiling of the 4H gate dimension (two passes per timestep).
    return b_tile, t_chunk, usage(b_tile, t_chunk)


# ----------------------------------------------------------------------------
# Wrapper
# ----------------------------------------------------------------------------
def lstm_model_forward(x_btf, params):
    """Matches LSTMModel.forward: x (B, T, input_size) -> (B, 1)."""
    B, T, F = x_btf.shape
    H = params["w_hh1"].shape[0]
    assert params["w_ih1"].shape[0] == F

    # ---- Phase 1: hoisted layer-1 input projection (row-tiled MXU matmul) ---
    # One wrapper transpose of X (B*T*F elements) buys contiguous time-major
    # GX slabs for the whole recurrence (B*T*4H elements), so it pays for itself.
    rows = B * T
    x_tb = jnp.transpose(x_btf, (1, 0, 2)).reshape(rows, F)
    row_tile = rows if rows <= 1024 else 512
    p1_need = (2 * row_tile * F * 4 + F * 4 * H * 2 + 4 * H * 4
               + 2 * row_tile * 4 * H * 2)
    p1_vmem = int(min(max(p1_need + (4 << 20), 24 << 20), 56 << 20))
    p1_bytes = rows * F * 4 + F * 4 * H * 2 + 4 * H * 4 + rows * 4 * H * 2

    gx2d = pl.pallas_call(
        input_proj_kernel,
        out_shape=jax.ShapeDtypeStruct((rows, 4 * H), jnp.bfloat16),
        grid=(pl.cdiv(rows, row_tile),),
        in_specs=[
            pl.BlockSpec((row_tile, F), lambda r: (r, 0)),
            pl.BlockSpec((F, 4 * H), lambda r: (0, 0),
                         pipeline_mode=pl.Buffered(1)),
            pl.BlockSpec((1, 4 * H), lambda r: (0, 0),
                         pipeline_mode=pl.Buffered(1)),
        ],
        out_specs=pl.BlockSpec((row_tile, 4 * H), lambda r: (r, 0)),
        compiler_params=pltpu.CompilerParams(
            dimension_semantics=("parallel",),
            vmem_limit_bytes=p1_vmem),
        cost_estimate=pl.CostEstimate(
            flops=2 * rows * F * 4 * H, transcendentals=0,
            bytes_accessed=p1_bytes),
    )(x_tb, params["w_ih1"], params["b1"])
    gx = gx2d.reshape(T, B, 4 * H)            # time-major, bf16

    # ---- Phase 2: fused 2-layer recurrence + FC head, single pallas_call ----
    budget = 40 << 20                          # conservative across v5e/v6e/v7x
    b_tile, t_chunk, need = _choose_tiles(B, T, H, budget)
    n_btiles = -(-B // b_tile)
    n_chunks = T // t_chunk
    vmem_limit = int(min(max(need + (4 << 20), 24 << 20), 56 << 20))

    def _const(block_shape):                   # grid-invariant, single-buffered
        return pl.BlockSpec(block_shape, lambda b, c: (0,) * len(block_shape),
                            pipeline_mode=pl.Buffered(1))

    kernel = functools.partial(fused_lstm_fc_kernel, hidden=H, t_chunk=t_chunk)
    p2_flops = 2 * B * T * 3 * H * 4 * H       # H->4H and 2H->4H per timestep
    p2_trans = 10 * B * T * H                  # sigmoid(3H)+tanh(2H) per layer
    p2_bytes = (B * T * 4 * H * 2 + (H * 4 * H + 2 * H * 4 * H) * 2
                + (4 * H + H + 1) * 4 + B * 4)

    out = pl.pallas_call(
        kernel,
        out_shape=jax.ShapeDtypeStruct((B, 1), jnp.float32),
        grid=(n_btiles, n_chunks),
        in_specs=[
            pl.BlockSpec((t_chunk, b_tile, 4 * H), lambda b, c: (c, b, 0)),
            _const((H, 4 * H)),        # W_hh1
            _const((2 * H, 4 * H)),    # [W_ih2 ; W_hh2]
            _const((1, 4 * H)),        # bias2
            _const((1, H)),            # fc weight
            _const((1, 1)),            # fc bias
        ],
        out_specs=pl.BlockSpec((b_tile, 1), lambda b, c: (b, 0)),
        scratch_shapes=[
            pltpu.VMEM((b_tile, H), jnp.float32),   # h1
            pltpu.VMEM((b_tile, H), jnp.float32),   # c1
            pltpu.VMEM((b_tile, H), jnp.float32),   # h2
            pltpu.VMEM((b_tile, H), jnp.float32),   # c2
        ],
        compiler_params=pltpu.CompilerParams(
            dimension_semantics=("parallel", "arbitrary"),
            vmem_limit_bytes=vmem_limit),
        cost_estimate=pl.CostEstimate(
            flops=p2_flops, transcendentals=p2_trans, bytes_accessed=p2_bytes),
    )(gx, params["w_hh1"], params["w2"], params["b2"],
      params["fc_w"], params["fc_b"])
    return out


# ----------------------------------------------------------------------------
# Parameter init (mimics nn.LSTM / nn.Linear uniform(-k, k)) + f32 reference
# ----------------------------------------------------------------------------
def _reorder_gates(w_t, H):
    """Reorder packed gate blocks on the last axis: [i, f, g, o] -> [i, f, o, g]."""
    i = w_t[..., 0 * H:1 * H]
    f = w_t[..., 1 * H:2 * H]
    g = w_t[..., 2 * H:3 * H]
    o = w_t[..., 3 * H:4 * H]
    return jnp.concatenate([i, f, o, g], axis=-1)


def init_params(key, input_size, hidden_size, num_layers,
                compute_dtype=jnp.bfloat16):
    """Returns (kernel params, raw PyTorch-layout f32 params for the reference)."""
    assert num_layers == 2, "fused kernel is specialized to the module's 2 layers"
    H = hidden_size
    bound = 1.0 / (H ** 0.5)
    keys = jax.random.split(key, 10)
    u = lambda k_, s: jax.random.uniform(k_, s, jnp.float32, -bound, bound)

    w_ih1 = u(keys[0], (4 * H, input_size)); w_hh1 = u(keys[1], (4 * H, H))
    b_ih1 = u(keys[2], (4 * H,));            b_hh1 = u(keys[3], (4 * H,))
    w_ih2 = u(keys[4], (4 * H, H));          w_hh2 = u(keys[5], (4 * H, H))
    b_ih2 = u(keys[6], (4 * H,));            b_hh2 = u(keys[7], (4 * H,))
    fc_w = u(keys[8], (1, H));               fc_b = u(keys[9], (1,))

    raw = dict(w_ih1=w_ih1, w_hh1=w_hh1, b_ih1=b_ih1, b_hh1=b_hh1,
               w_ih2=w_ih2, w_hh2=w_hh2, b_ih2=b_ih2, b_hh2=b_hh2,
               fc_w=fc_w, fc_b=fc_b)

    params = dict(
        w_ih1=_reorder_gates(w_ih1.T, H).astype(compute_dtype),      # (F, 4H)
        b1=_reorder_gates((b_ih1 + b_hh1).reshape(1, 4 * H), H),     # (1, 4H)
        w_hh1=_reorder_gates(w_hh1.T, H).astype(compute_dtype),      # (H, 4H)
        w2=jnp.concatenate([_reorder_gates(w_ih2.T, H),
                            _reorder_gates(w_hh2.T, H)],
                           axis=0).astype(compute_dtype),            # (2H, 4H)
        b2=_reorder_gates((b_ih2 + b_hh2).reshape(1, 4 * H), H),     # (1, 4H)
        fc_w=fc_w,                                                   # (1, H)
        fc_b=fc_b.reshape(1, 1),                                     # (1, 1)
    )
    return params, raw


def lstm_reference(x, raw):
    """Pure-JAX f32 reference of torch.nn.LSTM(batch_first) + Linear(H, 1)."""
    B, T, _ = x.shape
    H = raw["w_hh1"].shape[1]

    def cell(x_t, h, c, w_ih, w_hh, b_ih, b_hh):
        g = x_t @ w_ih.T + b_ih + h @ w_hh.T + b_hh
        i = jax.nn.sigmoid(g[:, 0 * H:1 * H])
        f = jax.nn.sigmoid(g[:, 1 * H:2 * H])
        gg = jnp.tanh(g[:, 2 * H:3 * H])
        o = jax.nn.sigmoid(g[:, 3 * H:4 * H])
        c = f * c + i * gg
        return o * jnp.tanh(c), c

    h1 = c1 = h2 = c2 = jnp.zeros((B, H), jnp.float32)
    for t in range(T):
        h1, c1 = cell(x[:, t], h1, c1, raw["w_ih1"], raw["w_hh1"],
                      raw["b_ih1"], raw["b_hh1"])
        h2, c2 = cell(h1, h2, c2, raw["w_ih2"], raw["w_hh2"],
                      raw["b_ih2"], raw["b_hh2"])
    return h2 @ raw["fc_w"].T + raw["fc_b"]


if __name__ == "__main__":
    # Small synthetic shapes consistent with the module's forward.
    batch, seq_len = 2, 8
    input_size, hidden_size, num_layers = 32, 32, 2

    root = jax.random.PRNGKey(0)
    kx, kp = jax.random.split(root)
    x = jax.random.normal(kx, (batch, seq_len, input_size), jnp.float32)

    params, raw = init_params(kp, input_size, hidden_size, num_layers)

    out = jax.jit(lstm_model_forward)(x, params)     # (batch, 1)
    out = jax.block_until_ready(out)
    assert out.shape == (batch, 1)

    # bf16 weights / bf16 GX drift vs the f32 reference — loose tolerance.
    ref = lstm_reference(x, raw)
    max_err = float(jnp.max(jnp.abs(out - ref)))
    assert max_err < 5e-2, f"mismatch vs f32 reference: {max_err}"
    print("KERNEL_OK")
</pallas_src>

<mosaic_0001>
module attributes {stable_mosaic.version = 11 : i64} {
  func.func @input_proj_kernel(%arg0: i32, %arg1: memref<16x32xf32, #tpu.memory_space<vmem>>, %arg2: memref<32x128xbf16, #tpu.memory_space<vmem>>, %arg3: memref<1x128xf32, #tpu.memory_space<vmem>>, %arg4: memref<16x128xbf16, #tpu.memory_space<vmem>>) attributes {dimension_semantics = [#tpu.dimension_semantics<parallel>], iteration_bounds = array<i64: 1>, scalar_prefetch = 0 : i64, scratch_operands = 0 : i64, tpu.core_type = #tpu.core_type<tc>, window_params = [{transform_indices = @transform_0, window_bounds = array<i64: 16, 32>}, {pipeline_mode = #tpu.pipeline_mode<synchronous>, transform_indices = @transform_1, window_bounds = array<i64: 32, 128>}, {pipeline_mode = #tpu.pipeline_mode<synchronous>, transform_indices = @transform_2, window_bounds = array<i64: 1, 128>}, {transform_indices = @transform_3, window_bounds = array<i64: 16, 128>}]} {
    %c0 = arith.constant 0 : index
    %c0_0 = arith.constant 0 : index
    %0 = vector.load %arg1[%c0, %c0_0] : memref<16x32xf32, #tpu.memory_space<vmem>>, vector<16x32xf32>
    %1 = arith.truncf %0 : vector<16x32xf32> to vector<16x32xbf16>
    %c0_1 = arith.constant 0 : index
    %c0_2 = arith.constant 0 : index
    %2 = vector.load %arg2[%c0_1, %c0_2] : memref<32x128xbf16, #tpu.memory_space<vmem>>, vector<32x128xbf16>
    %cst = arith.constant dense<0.000000e+00> : vector<16x128xf32>
    %3 = tpu.matmul %1, %2, %cst {dimension_numbers = #tpu.dot_dimension_numbers<[1], [0], [0], [1], [0, 0, 1, 1], [], []>} : vector<16x32xbf16>, vector<32x128xbf16>, vector<16x128xf32> -> vector<16x128xf32>
    %c0_3 = arith.constant 0 : index
    %c0_4 = arith.constant 0 : index
    %4 = vector.load %arg3[%c0_3, %c0_4] : memref<1x128xf32, #tpu.memory_space<vmem>>, vector<1x128xf32>
    %5 = vector.broadcast %4 : vector<1x128xf32> to vector<16x128xf32>
    %6 = arith.addf %3, %5 : vector<16x128xf32>
    %7 = arith.truncf %6 : vector<16x128xf32> to vector<16x128xbf16>
    %c0_5 = arith.constant 0 : index
    %c0_6 = arith.constant 0 : index
    %8 = vector.load %arg4[%c0_5, %c0_6] : memref<16x128xbf16, #tpu.memory_space<vmem>>, vector<16x128xbf16>
    tpu.vector_store %arg4[%c0_5, %c0_6], %7 {strides = array<i32>} : memref<16x128xbf16, #tpu.memory_space<vmem>>, vector<16x128xbf16>,
    return
  }
  func.func @transform_0(%arg0: i32) -> (i32, i32) {
    %c0_i32 = arith.constant 0 : i32
    %c0_i32_0 = arith.constant 0 : i32
    return %arg0, %c0_i32 : i32, i32
  }
  func.func @transform_1(%arg0: i32) -> (i32, i32) {
    %c0_i32 = arith.constant 0 : i32
    %c0_i32_0 = arith.constant 0 : i32
    %c0_i32_1 = arith.constant 0 : i32
    return %c0_i32, %c0_i32_0 : i32, i32
  }
  func.func @transform_2(%arg0: i32) -> (i32, i32) {
    %c0_i32 = arith.constant 0 : i32
    %c0_i32_0 = arith.constant 0 : i32
    %c0_i32_1 = arith.constant 0 : i32
    return %c0_i32, %c0_i32_0 : i32, i32
  }
  func.func @transform_3(%arg0: i32) -> (i32, i32) {
    %c0_i32 = arith.constant 0 : i32
    %c0_i32_0 = arith.constant 0 : i32
    return %arg0, %c0_i32 : i32, i32
  }
}

module attributes {stable_mosaic.version = 11 : i64} {
  func.func @fused_lstm_fc_kernel(%arg0: i32, %arg1: i32, %arg2: memref<8x2x128xbf16, #tpu.memory_space<vmem>>, %arg3: memref<32x128xbf16, #tpu.memory_space<vmem>>, %arg4: memref<64x128xbf16, #tpu.memory_space<vmem>>, %arg5: memref<1x128xf32, #tpu.memory_space<vmem>>, %arg6: memref<1x32xf32, #tpu.memory_space<vmem>>, %arg7: memref<1x1xf32, #tpu.memory_space<vmem>>, %arg8: memref<2x1xf32, #tpu.memory_space<vmem>>, %arg9: memref<2x32xf32, #tpu.memory_space<vmem>>, %arg10: memref<2x32xf32, #tpu.memory_space<vmem>>, %arg11: memref<2x32xf32, #tpu.memory_space<vmem>>, %arg12: memref<2x32xf32, #tpu.memory_space<vmem>>) attributes {dimension_semantics = [#tpu.dimension_semantics<parallel>, #tpu.dimension_semantics<arbitrary>], iteration_bounds = array<i64: 1, 1>, scalar_prefetch = 0 : i64, scratch_operands = 4 : i64, tpu.core_type = #tpu.core_type<tc>, window_params = [{transform_indices = @transform_0, window_bounds = array<i64: 8, 2, 128>}, {pipeline_mode = #tpu.pipeline_mode<synchronous>, transform_indices = @transform_1, window_bounds = array<i64: 32, 128>}, {pipeline_mode = #tpu.pipeline_mode<synchronous>, transform_indices = @transform_2, window_bounds = array<i64: 64, 128>}, {pipeline_mode = #tpu.pipeline_mode<synchronous>, transform_indices = @transform_3, window_bounds = array<i64: 1, 128>}, {pipeline_mode = #tpu.pipeline_mode<synchronous>, transform_indices = @transform_4, window_bounds = array<i64: 1, 32>}, {pipeline_mode = #tpu.pipeline_mode<synchronous>, transform_indices = @transform_5, window_bounds = array<i64: 1, 1>}, {transform_indices = @transform_6, window_bounds = array<i64: 2, 1>}]} {
    %c0_i32 = arith.constant 0 : i32
    %0 = arith.cmpi eq, %arg1, %c0_i32 : i32
    %1 = arith.extui %0 : i1 to i32
    %c0_i32_0 = arith.constant 0 : i32
    %2 = arith.cmpi ne, %1, %c0_i32_0 : i32
    scf.if %2 {
      %cst_72 = arith.constant 0.000000e+00 : f32
      %369 = vector.broadcast %cst_72 : f32 to vector<2x32xf32>
      %c0_73 = arith.constant 0 : index
      %c0_74 = arith.constant 0 : index
      %370 = vector.load %arg9[%c0_73, %c0_74] : memref<2x32xf32, #tpu.memory_space<vmem>>, vector<2x32xf32>
      tpu.vector_store %arg9[%c0_73, %c0_74], %369 {strides = array<i32>} : memref<2x32xf32, #tpu.memory_space<vmem>>, vector<2x32xf32>,
      %cst_75 = arith.constant 0.000000e+00 : f32
      %371 = vector.broadcast %cst_75 : f32 to vector<2x32xf32>
      %c0_76 = arith.constant 0 : index
      %c0_77 = arith.constant 0 : index
      %372 = vector.load %arg10[%c0_76, %c0_77] : memref<2x32xf32, #tpu.memory_space<vmem>>, vector<2x32xf32>
      tpu.vector_store %arg10[%c0_76, %c0_77], %371 {strides = array<i32>} : memref<2x32xf32, #tpu.memory_space<vmem>>, vector<2x32xf32>,
      %cst_78 = arith.constant 0.000000e+00 : f32
      %373 = vector.broadcast %cst_78 : f32 to vector<2x32xf32>
      %c0_79 = arith.constant 0 : index
      %c0_80 = arith.constant 0 : index
      %374 = vector.load %arg11[%c0_79, %c0_80] : memref<2x32xf32, #tpu.memory_space<vmem>>, vector<2x32xf32>
      tpu.vector_store %arg11[%c0_79, %c0_80], %373 {strides = array<i32>} : memref<2x32xf32, #tpu.memory_space<vmem>>, vector<2x32xf32>,
      %cst_81 = arith.constant 0.000000e+00 : f32
      %375 = vector.broadcast %cst_81 : f32 to vector<2x32xf32>
      %c0_82 = arith.constant 0 : index
      %c0_83 = arith.constant 0 : index
      %376 = vector.load %arg12[%c0_82, %c0_83] : memref<2x32xf32, #tpu.memory_space<vmem>>, vector<2x32xf32>
      tpu.vector_store %arg12[%c0_82, %c0_83], %375 {strides = array<i32>} : memref<2x32xf32, #tpu.memory_space<vmem>>, vector<2x32xf32>,
    } else {
    }
    %c0 = arith.constant 0 : index
    %c0_1 = arith.constant 0 : index
    %3 = vector.load %arg3[%c0, %c0_1] : memref<32x128xbf16, #tpu.memory_space<vmem>>, vector<32x128xbf16>
    %c0_2 = arith.constant 0 : index
    %c0_3 = arith.constant 0 : index
    %4 = vector.load %arg4[%c0_2, %c0_3] : memref<64x128xbf16, #tpu.memory_space<vmem>>, vector<64x128xbf16>
    %c0_4 = arith.constant 0 : index
    %c0_5 = arith.constant 0 : index
    %5 = vector.load %arg5[%c0_4, %c0_5] : memref<1x128xf32, #tpu.memory_space<vmem>>, vector<1x128xf32>
    %c0_6 = arith.constant 0 : index
    %c0_7 = arith.constant 0 : index
    %6 = vector.load %arg9[%c0_6, %c0_7] : memref<2x32xf32, #tpu.memory_space<vmem>>, vector<2x32xf32>
    %c0_8 = arith.constant 0 : index
    %c0_9 = arith.constant 0 : index
    %7 = vector.load %arg10[%c0_8, %c0_9] : memref<2x32xf32, #tpu.memory_space<vmem>>, vector<2x32xf32>
    %c0_10 = arith.constant 0 : index
    %c0_11 = arith.constant 0 : index
    %8 = vector.load %arg11[%c0_10, %c0_11] : memref<2x32xf32, #tpu.memory_space<vmem>>, vector<2x32xf32>
    %c0_12 = arith.constant 0 : index
    %c0_13 = arith.constant 0 : index
    %9 = vector.load %arg12[%c0_12, %c0_13] : memref<2x32xf32, #tpu.memory_space<vmem>>, vector<2x32xf32>
    %c0_i32_14 = arith.constant 0 : i32
    %10 = arith.index_cast %c0_i32_14 : i32 to index
    %c0_15 = arith.constant 0 : index
    %c0_16 = arith.constant 0 : index
    %11 = vector.load %arg2[%10, %c0_15, %c0_16] : memref<8x2x128xbf16, #tpu.memory_space<vmem>>, vector<1x2x128xbf16>
    %12 = vector.shape_cast %11 : vector<1x2x128xbf16> to vector<2x128xbf16>
    %13 = arith.extf %12 : vector<2x128xbf16> to vector<2x128xf32>
    %14 = arith.truncf %6 : vector<2x32xf32> to vector<2x32xbf16>
    %cst = arith.constant dense<0.000000e+00> : vector<2x128xf32>
    %15 = tpu.matmul %14, %3, %cst {dimension_numbers = #tpu.dot_dimension_numbers<[1], [0], [0], [1], [0, 0, 1, 1], [], []>} : vector<2x32xbf16>, vector<32x128xbf16>, vector<2x128xf32> -> vector<2x128xf32>
    %16 = arith.addf %13, %15 : vector<2x128xf32>
    %17 = vector.extract_strided_slice %16 {offsets = [0, 0], sizes = [2, 96], strides = [1, 1]} : vector<2x128xf32> to vector<2x96xf32>
    %18 = arith.negf %17 : vector<2x96xf32>
    %19 = math.exp %18 : vector<2x96xf32>
    %cst_17 = arith.constant 1.000000e+00 : f32
    %20 = vector.broadcast %cst_17 : f32 to vector<2x96xf32>
    %21 = arith.addf %20, %19 : vector<2x96xf32>
    %22 = arith.divf %20, %21 : vector<2x96xf32>
    %23 = vector.extract_strided_slice %22 {offsets = [0, 0], sizes = [2, 32], strides = [1, 1]} : vector<2x96xf32> to vector<2x32xf32>
    %24 = vector.extract_strided_slice %22 {offsets = [0, 32], sizes = [2, 32], strides = [1, 1]} : vector<2x96xf32> to vector<2x32xf32>
    %25 = vector.extract_strided_slice %22 {offsets = [0, 64], sizes = [2, 32], strides = [1, 1]} : vector<2x96xf32> to vector<2x32xf32>
    %26 = vector.extract_strided_slice %16 {offsets = [0, 96], sizes = [2, 32], strides = [1, 1]} : vector<2x128xf32> to vector<2x32xf32>
    %27 = math.tanh %26 : vector<2x32xf32>
    %28 = arith.mulf %24, %7 : vector<2x32xf32>
    %29 = arith.mulf %23, %27 : vector<2x32xf32>
    %30 = arith.addf %28, %29 : vector<2x32xf32>
    %31 = math.tanh %30 : vector<2x32xf32>
    %32 = arith.mulf %25, %31 : vector<2x32xf32>
    %33 = tpu.concatenate %32, %8 in 1 : vector<2x32xf32>, vector<2x32xf32> -> vector<2x64xf32>
    %34 = arith.truncf %33 : vector<2x64xf32> to vector<2x64xbf16>
    %cst_18 = arith.constant dense<0.000000e+00> : vector<2x128xf32>
    %35 = tpu.matmul %34, %4, %cst_18 {dimension_numbers = #tpu.dot_dimension_numbers<[1], [0], [0], [1], [0, 0, 1, 1], [], []>} : vector<2x64xbf16>, vector<64x128xbf16>, vector<2x128xf32> -> vector<2x128xf32>
    %36 = vector.broadcast %5 : vector<1x128xf32> to vector<2x128xf32>
    %37 = arith.addf %35, %36 : vector<2x128xf32>
    %38 = vector.extract_strided_slice %37 {offsets = [0, 0], sizes = [2, 96], strides = [1, 1]} : vector<2x128xf32> to vector<2x96xf32>
    %39 = arith.negf %38 : vector<2x96xf32>
    %40 = math.exp %39 : vector<2x96xf32>
    %cst_19 = arith.constant 1.000000e+00 : f32
    %41 = vector.broadcast %cst_19 : f32 to vector<2x96xf32>
    %42 = arith.addf %41, %40 : vector<2x96xf32>
    %43 = arith.divf %41, %42 : vector<2x96xf32>
    %44 = vector.extract_strided_slice %43 {offsets = [0, 0], sizes = [2, 32], strides = [1, 1]} : vector<2x96xf32> to vector<2x32xf32>
    %45 = vector.extract_strided_slice %43 {offsets = [0, 32], sizes = [2, 32], strides = [1, 1]} : vector<2x96xf32> to vector<2x32xf32>
    %46 = vector.extract_strided_slice %43 {offsets = [0, 64], sizes = [2, 32], strides = [1, 1]} : vector<2x96xf32> to vector<2x32xf32>
    %47 = vector.extract_strided_slice %37 {offsets = [0, 96], sizes = [2, 32], strides = [1, 1]} : vector<2x128xf32> to vector<2x32xf32>
    %48 = math.tanh %47 : vector<2x32xf32>
    %49 = arith.mulf %45, %9 : vector<2x32xf32>
    %50 = arith.mulf %44, %48 : vector<2x32xf32>
    %51 = arith.addf %49, %50 : vector<2x32xf32>
    %52 = math.tanh %51 : vector<2x32xf32>
    %53 = arith.mulf %46, %52 : vector<2x32xf32>
    %c1_i32 = arith.constant 1 : i32
    %54 = arith.index_cast %c1_i32 : i32 to index
    %c0_20 = arith.constant 0 : index
    %c0_21 = arith.constant 0 : index
    %55 = vector.load %arg2[%54, %c0_20, %c0_21] : memref<8x2x128xbf16, #tpu.memory_space<vmem>>, vector<1x2x128xbf16>
    %56 = vector.shape_cast %55 : vector<1x2x128xbf16> to vector<2x128xbf16>
    %57 = arith.extf %56 : vector<2x128xbf16> to vector<2x128xf32>
    %58 = arith.truncf %32 : vector<2x32xf32> to vector<2x32xbf16>
    %cst_22 = arith.constant dense<0.000000e+00> : vector<2x128xf32>
    %59 = tpu.matmul %58, %3, %cst_22 {dimension_numbers = #tpu.dot_dimension_numbers<[1], [0], [0], [1], [0, 0, 1, 1], [], []>} : vector<2x32xbf16>, vector<32x128xbf16>, vector<2x128xf32> -> vector<2x128xf32>
    %60 = arith.addf %57, %59 : vector<2x128xf32>
    %61 = vector.extract_strided_slice %60 {offsets = [0, 0], sizes = [2, 96], strides = [1, 1]} : vector<2x128xf32> to vector<2x96xf32>
    %62 = arith.negf %61 : vector<2x96xf32>
    %63 = math.exp %62 : vector<2x96xf32>
    %cst_23 = arith.constant 1.000000e+00 : f32
    %64 = vector.broadcast %cst_23 : f32 to vector<2x96xf32>
    %65 = arith.addf %64, %63 : vector<2x96xf32>
    %66 = arith.divf %64, %65 : vector<2x96xf32>
    %67 = vector.extract_strided_slice %66 {offsets = [0, 0], sizes = [2, 32], strides = [1, 1]} : vector<2x96xf32> to vector<2x32xf32>
    %68 = vector.extract_strided_slice %66 {offsets = [0, 32], sizes = [2, 32], strides = [1, 1]} : vector<2x96xf32> to vector<2x32xf32>
    %69 = vector.extract_strided_slice %66 {offsets = [0, 64], sizes = [2, 32], strides = [1, 1]} : vector<2x96xf32> to vector<2x32xf32>
    %70 = vector.extract_strided_slice %60 {offsets = [0, 96], sizes = [2, 32], strides = [1, 1]} : vector<2x128xf32> to vector<2x32xf32>
    %71 = math.tanh %70 : vector<2x32xf32>
    %72 = arith.mulf %68, %30 : vector<2x32xf32>
    %73 = arith.mulf %67, %71 : vector<2x32xf32>
    %74 = arith.addf %72, %73 : vector<2x32xf32>
    %75 = math.tanh %74 : vector<2x32xf32>
    %76 = arith.mulf %69, %75 : vector<2x32xf32>
    %77 = tpu.concatenate %76, %53 in 1 : vector<2x32xf32>, vector<2x32xf32> -> vector<2x64xf32>
    %78 = arith.truncf %77 : vector<2x64xf32> to vector<2x64xbf16>
    %cst_24 = arith.constant dense<0.000000e+00> : vector<2x128xf32>
    %79 = tpu.matmul %78, %4, %cst_24 {dimension_numbers = #tpu.dot_dimension_numbers<[1], [0], [0], [1], [0, 0, 1, 1], [], []>} : vector<2x64xbf16>, vector<64x128xbf16>, vector<2x128xf32> -> vector<2x128xf32>
    %80 = vector.broadcast %5 : vector<1x128xf32> to vector<2x128xf32>
    %81 = arith.addf %79, %80 : vector<2x128xf32>
    %82 = vector.extract_strided_slice %81 {offsets = [0, 0], sizes = [2, 96], strides = [1, 1]} : vector<2x128xf32> to vector<2x96xf32>
    %83 = arith.negf %82 : vector<2x96xf32>
    %84 = math.exp %83 : vector<2x96xf32>
    %cst_25 = arith.constant 1.000000e+00 : f32
    %85 = vector.broadcast %cst_25 : f32 to vector<2x96xf32>
    %86 = arith.addf %85, %84 : vector<2x96xf32>
    %87 = arith.divf %85, %86 : vector<2x96xf32>
    %88 = vector.extract_strided_slice %87 {offsets = [0, 0], sizes = [2, 32], strides = [1, 1]} : vector<2x96xf32> to vector<2x32xf32>
    %89 = vector.extract_strided_slice %87 {offsets = [0, 32], sizes = [2, 32], strides = [1, 1]} : vector<2x96xf32> to vector<2x32xf32>
    %90 = vector.extract_strided_slice %87 {offsets = [0, 64], sizes = [2, 32], strides = [1, 1]} : vector<2x96xf32> to vector<2x32xf32>
    %91 = vector.extract_strided_slice %81 {offsets = [0, 96], sizes = [2, 32], strides = [1, 1]} : vector<2x128xf32> to vector<2x32xf32>
    %92 = math.tanh %91 : vector<2x32xf32>
    %93 = arith.mulf %89, %51 : vector<2x32xf32>
    %94 = arith.mulf %88, %92 : vector<2x32xf32>
    %95 = arith.addf %93, %94 : vector<2x32xf32>
    %96 = math.tanh %95 : vector<2x32xf32>
    %97 = arith.mulf %90, %96 : vector<2x32xf32>
    %c2_i32 = arith.constant 2 : i32
    %98 = arith.index_cast %c2_i32 : i32 to index
    %c0_26 = arith.constant 0 : index
    %c0_27 = arith.constant 0 : index
    %99 = vector.load %arg2[%98, %c0_26, %c0_27] : memref<8x2x128xbf16, #tpu.memory_space<vmem>>, vector<1x2x128xbf16>
    %100 = vector.shape_cast %99 : vector<1x2x128xbf16> to vector<2x128xbf16>
    %101 = arith.extf %100 : vector<2x128xbf16> to vector<2x128xf32>
    %102 = arith.truncf %76 : vector<2x32xf32> to vector<2x32xbf16>
    %cst_28 = arith.constant dense<0.000000e+00> : vector<2x128xf32>
    %103 = tpu.matmul %102, %3, %cst_28 {dimension_numbers = #tpu.dot_dimension_numbers<[1], [0], [0], [1], [0, 0, 1, 1], [], []>} : vector<2x32xbf16>, vector<32x128xbf16>, vector<2x128xf32> -> vector<2x128xf32>
    %104 = arith.addf %101, %103 : vector<2x128xf32>
    %105 = vector.extract_strided_slice %104 {offsets = [0, 0], sizes = [2, 96], strides = [1, 1]} : vector<2x128xf32> to vector<2x96xf32>
    %106 = arith.negf %105 : vector<2x96xf32>
    %107 = math.exp %106 : vector<2x96xf32>
    %cst_29 = arith.constant 1.000000e+00 : f32
    %108 = vector.broadcast %cst_29 : f32 to vector<2x96xf32>
    %109 = arith.addf %108, %107 : vector<2x96xf32>
    %110 = arith.divf %108, %109 : vector<2x96xf32>
    %111 = vector.extract_strided_slice %110 {offsets = [0, 0], sizes = [2, 32], strides = [1, 1]} : vector<2x96xf32> to vector<2x32xf32>
    %112 = vector.extract_strided_slice %110 {offsets = [0, 32], sizes = [2, 32], strides = [1, 1]} : vector<2x96xf32> to vector<2x32xf32>
    %113 = vector.extract_strided_slice %110 {offsets = [0, 64], sizes = [2, 32], strides = [1, 1]} : vector<2x96xf32> to vector<2x32xf32>
    %114 = vector.extract_strided_slice %104 {offsets = [0, 96], sizes = [2, 32], strides = [1, 1]} : vector<2x128xf32> to vector<2x32xf32>
    %115 = math.tanh %114 : vector<2x32xf32>
    %116 = arith.mulf %112, %74 : vector<2x32xf32>
    %117 = arith.mulf %111, %115 : vector<2x32xf32>
    %118 = arith.addf %116, %117 : vector<2x32xf32>
    %119 = math.tanh %118 : vector<2x32xf32>
    %120 = arith.mulf %113, %119 : vector<2x32xf32>
    %121 = tpu.concatenate %120, %97 in 1 : vector<2x32xf32>, vector<2x32xf32> -> vector<2x64xf32>
    %122 = arith.truncf %121 : vector<2x64xf32> to vector<2x64xbf16>
    %cst_30 = arith.constant dense<0.000000e+00> : vector<2x128xf32>
    %123 = tpu.matmul %122, %4, %cst_30 {dimension_numbers = #tpu.dot_dimension_numbers<[1], [0], [0], [1], [0, 0, 1, 1], [], []>} : vector<2x64xbf16>, vector<64x128xbf16>, vector<2x128xf32> -> vector<2x128xf32>
    %124 = vector.broadcast %5 : vector<1x128xf32> to vector<2x128xf32>
    %125 = arith.addf %123, %124 : vector<2x128xf32>
    %126 = vector.extract_strided_slice %125 {offsets = [0, 0], sizes = [2, 96], strides = [1, 1]} : vector<2x128xf32> to vector<2x96xf32>
    %127 = arith.negf %126 : vector<2x96xf32>
    %128 = math.exp %127 : vector<2x96xf32>
    %cst_31 = arith.constant 1.000000e+00 : f32
    %129 = vector.broadcast %cst_31 : f32 to vector<2x96xf32>
    %130 = arith.addf %129, %128 : vector<2x96xf32>
    %131 = arith.divf %129, %130 : vector<2x96xf32>
    %132 = vector.extract_strided_slice %131 {offsets = [0, 0], sizes = [2, 32], strides = [1, 1]} : vector<2x96xf32> to vector<2x32xf32>
    %133 = vector.extract_strided_slice %131 {offsets = [0, 32], sizes = [2, 32], strides = [1, 1]} : vector<2x96xf32> to vector<2x32xf32>
    %134 = vector.extract_strided_slice %131 {offsets = [0, 64], sizes = [2, 32], strides = [1, 1]} : vector<2x96xf32> to vector<2x32xf32>
    %135 = vector.extract_strided_slice %125 {offsets = [0, 96], sizes = [2, 32], strides = [1, 1]} : vector<2x128xf32> to vector<2x32xf32>
    %136 = math.tanh %135 : vector<2x32xf32>
    %137 = arith.mulf %133, %95 : vector<2x32xf32>
    %138 = arith.mulf %132, %136 : vector<2x32xf32>
    %139 = arith.addf %137, %138 : vector<2x32xf32>
    %140 = math.tanh %139 : vector<2x32xf32>
    %141 = arith.mulf %134, %140 : vector<2x32xf32>
    %c3_i32 = arith.constant 3 : i32
    %142 = arith.index_cast %c3_i32 : i32 to index
    %c0_32 = arith.constant 0 : index
    %c0_33 = arith.constant 0 : index
    %143 = vector.load %arg2[%142, %c0_32, %c0_33] : memref<8x2x128xbf16, #tpu.memory_space<vmem>>, vector<1x2x128xbf16>
    %144 = vector.shape_cast %143 : vector<1x2x128xbf16> to vector<2x128xbf16>
    %145 = arith.extf %144 : vector<2x128xbf16> to vector<2x128xf32>
    %146 = arith.truncf %120 : vector<2x32xf32> to vector<2x32xbf16>
    %cst_34 = arith.constant dense<0.000000e+00> : vector<2x128xf32>
    %147 = tpu.matmul %146, %3, %cst_34 {dimension_numbers = #tpu.dot_dimension_numbers<[1], [0], [0], [1], [0, 0, 1, 1], [], []>} : vector<2x32xbf16>, vector<32x128xbf16>, vector<2x128xf32> -> vector<2x128xf32>
    %148 = arith.addf %145, %147 : vector<2x128xf32>
    %149 = vector.extract_strided_slice %148 {offsets = [0, 0], sizes = [2, 96], strides = [1, 1]} : vector<2x128xf32> to vector<2x96xf32>
    %150 = arith.negf %149 : vector<2x96xf32>
    %151 = math.exp %150 : vector<2x96xf32>
    %cst_35 = arith.constant 1.000000e+00 : f32
    %152 = vector.broadcast %cst_35 : f32 to vector<2x96xf32>
    %153 = arith.addf %152, %151 : vector<2x96xf32>
    %154 = arith.divf %152, %153 : vector<2x96xf32>
    %155 = vector.extract_strided_slice %154 {offsets = [0, 0], sizes = [2, 32], strides = [1, 1]} : vector<2x96xf32> to vector<2x32xf32>
    %156 = vector.extract_strided_slice %154 {offsets = [0, 32], sizes = [2, 32], strides = [1, 1]} : vector<2x96xf32> to vector<2x32xf32>
    %157 = vector.extract_strided_slice %154 {offsets = [0, 64], sizes = [2, 32], strides = [1, 1]} : vector<2x96xf32> to vector<2x32xf32>
    %158 = vector.extract_strided_slice %148 {offsets = [0, 96], sizes = [2, 32], strides = [1, 1]} : vector<2x128xf32> to vector<2x32xf32>
    %159 = math.tanh %158 : vector<2x32xf32>
    %160 = arith.mulf %156, %118 : vector<2x32xf32>
    %161 = arith.mulf %155, %159 : vector<2x32xf32>
    %162 = arith.addf %160, %161 : vector<2x32xf32>
    %163 = math.tanh %162 : vector<2x32xf32>
    %164 = arith.mulf %157, %163 : vector<2x32xf32>
    %165 = tpu.concatenate %164, %141 in 1 : vector<2x32xf32>, vector<2x32xf32> -> vector<2x64xf32>
    %166 = arith.truncf %165 : vector<2x64xf32> to vector<2x64xbf16>
    %cst_36 = arith.constant dense<0.000000e+00> : vector<2x128xf32>
    %167 = tpu.matmul %166, %4, %cst_36 {dimension_numbers = #tpu.dot_dimension_numbers<[1], [0], [0], [1], [0, 0, 1, 1], [], []>} : vector<2x64xbf16>, vector<64x128xbf16>, vector<2x128xf32> -> vector<2x128xf32>
    %168 = vector.broadcast %5 : vector<1x128xf32> to vector<2x128xf32>
    %169 = arith.addf %167, %168 : vector<2x128xf32>
    %170 = vector.extract_strided_slice %169 {offsets = [0, 0], sizes = [2, 96], strides = [1, 1]} : vector<2x128xf32> to vector<2x96xf32>
    %171 = arith.negf %170 : vector<2x96xf32>
    %172 = math.exp %171 : vector<2x96xf32>
    %cst_37 = arith.constant 1.000000e+00 : f32
    %173 = vector.broadcast %cst_37 : f32 to vector<2x96xf32>
    %174 = arith.addf %173, %172 : vector<2x96xf32>
    %175 = arith.divf %173, %174 : vector<2x96xf32>
    %176 = vector.extract_strided_slice %175 {offsets = [0, 0], sizes = [2, 32], strides = [1, 1]} : vector<2x96xf32> to vector<2x32xf32>
    %177 = vector.extract_strided_slice %175 {offsets = [0, 32], sizes = [2, 32], strides = [1, 1]} : vector<2x96xf32> to vector<2x32xf32>
    %178 = vector.extract_strided_slice %175 {offsets = [0, 64], sizes = [2, 32], strides = [1, 1]} : vector<2x96xf32> to vector<2x32xf32>
    %179 = vector.extract_strided_slice %169 {offsets = [0, 96], sizes = [2, 32], strides = [1, 1]} : vector<2x128xf32> to vector<2x32xf32>
    %180 = math.tanh %179 : vector<2x32xf32>
    %181 = arith.mulf %177, %139 : vector<2x32xf32>
    %182 = arith.mulf %176, %180 : vector<2x32xf32>
    %183 = arith.addf %181, %182 : vector<2x32xf32>
    %184 = math.tanh %183 : vector<2x32xf32>
    %185 = arith.mulf %178, %184 : vector<2x32xf32>
    %c4_i32 = arith.constant 4 : i32
    %186 = arith.index_cast %c4_i32 : i32 to index
    %c0_38 = arith.constant 0 : index
    %c0_39 = arith.constant 0 : index
    %187 = vector.load %arg2[%186, %c0_38, %c0_39] : memref<8x2x128xbf16, #tpu.memory_space<vmem>>, vector<1x2x128xbf16>
    %188 = vector.shape_cast %187 : vector<1x2x128xbf16> to vector<2x128xbf16>
    %189 = arith.extf %188 : vector<2x128xbf16> to vector<2x128xf32>
    %190 = arith.truncf %164 : vector<2x32xf32> to vector<2x32xbf16>
    %cst_40 = arith.constant dense<0.000000e+00> : vector<2x128xf32>
    %191 = tpu.matmul %190, %3, %cst_40 {dimension_numbers = #tpu.dot_dimension_numbers<[1], [0], [0], [1], [0, 0, 1, 1], [], []>} : vector<2x32xbf16>, vector<32x128xbf16>, vector<2x128xf32> -> vector<2x128xf32>
    %192 = arith.addf %189, %191 : vector<2x128xf32>
    %193 = vector.extract_strided_slice %192 {offsets = [0, 0], sizes = [2, 96], strides = [1, 1]} : vector<2x128xf32> to vector<2x96xf32>
    %194 = arith.negf %193 : vector<2x96xf32>
    %195 = math.exp %194 : vector<2x96xf32>
    %cst_41 = arith.constant 1.000000e+00 : f32
    %196 = vector.broadcast %cst_41 : f32 to vector<2x96xf32>
    %197 = arith.addf %196, %195 : vector<2x96xf32>
    %198 = arith.divf %196, %197 : vector<2x96xf32>
    %199 = vector.extract_strided_slice %198 {offsets = [0, 0], sizes = [2, 32], strides = [1, 1]} : vector<2x96xf32> to vector<2x32xf32>
    %200 = vector.extract_strided_slice %198 {offsets = [0, 32], sizes = [2, 32], strides = [1, 1]} : vector<2x96xf32> to vector<2x32xf32>
    %201 = vector.extract_strided_slice %198 {offsets = [0, 64], sizes = [2, 32], strides = [1, 1]} : vector<2x96xf32> to vector<2x32xf32>
    %202 = vector.extract_strided_slice %192 {offsets = [0, 96], sizes = [2, 32], strides = [1, 1]} : vector<2x128xf32> to vector<2x32xf32>
    %203 = math.tanh %202 : vector<2x32xf32>
    %204 = arith.mulf %200, %162 : vector<2x32xf32>
    %205 = arith.mulf %199, %203 : vector<2x32xf32>
    %206 = arith.addf %204, %205 : vector<2x32xf32>
    %207 = math.tanh %206 : vector<2x32xf32>
    %208 = arith.mulf %201, %207 : vector<2x32xf32>
    %209 = tpu.concatenate %208, %185 in 1 : vector<2x32xf32>, vector<2x32xf32> -> vector<2x64xf32>
    %210 = arith.truncf %209 : vector<2x64xf32> to vector<2x64xbf16>
    %cst_42 = arith.constant dense<0.000000e+00> : vector<2x128xf32>
    %211 = tpu.matmul %210, %4, %cst_42 {dimension_numbers = #tpu.dot_dimension_numbers<[1], [0], [0], [1], [0, 0, 1, 1], [], []>} : vector<2x64xbf16>, vector<64x128xbf16>, vector<2x128xf32> -> vector<2x128xf32>
    %212 = vector.broadcast %5 : vector<1x128xf32> to vector<2x128xf32>
    %213 = arith.addf %211, %212 : vector<2x128xf32>
    %214 = vector.extract_strided_slice %213 {offsets = [0, 0], sizes = [2, 96], strides = [1, 1]} : vector<2x128xf32> to vector<2x96xf32>
    %215 = arith.negf %214 : vector<2x96xf32>
    %216 = math.exp %215 : vector<2x96xf32>
    %cst_43 = arith.constant 1.000000e+00 : f32
    %217 = vector.broadcast %cst_43 : f32 to vector<2x96xf32>
    %218 = arith.addf %217, %216 : vector<2x96xf32>
    %219 = arith.divf %217, %218 : vector<2x96xf32>
    %220 = vector.extract_strided_slice %219 {offsets = [0, 0], sizes = [2, 32], strides = [1, 1]} : vector<2x96xf32> to vector<2x32xf32>
    %221 = vector.extract_strided_slice %219 {offsets = [0, 32], sizes = [2, 32], strides = [1, 1]} : vector<2x96xf32> to vector<2x32xf32>
    %222 = vector.extract_strided_slice %219 {offsets = [0, 64], sizes = [2, 32], strides = [1, 1]} : vector<2x96xf32> to vector<2x32xf32>
    %223 = vector.extract_strided_slice %213 {offsets = [0, 96], sizes = [2, 32], strides = [1, 1]} : vector<2x128xf32> to vector<2x32xf32>
    %224 = math.tanh %223 : vector<2x32xf32>
    %225 = arith.mulf %221, %183 : vector<2x32xf32>
    %226 = arith.mulf %220, %224 : vector<2x32xf32>
    %227 = arith.addf %225, %226 : vector<2x32xf32>
    %228 = math.tanh %227 : vector<2x32xf32>
    %229 = arith.mulf %222, %228 : vector<2x32xf32>
    %c5_i32 = arith.constant 5 : i32
    %230 = arith.index_cast %c5_i32 : i32 to index
    %c0_44 = arith.constant 0 : index
    %c0_45 = arith.constant 0 : index
    %231 = vector.load %arg2[%230, %c0_44, %c0_45] : memref<8x2x128xbf16, #tpu.memory_space<vmem>>, vector<1x2x128xbf16>
    %232 = vector.shape_cast %231 : vector<1x2x128xbf16> to vector<2x128xbf16>
    %233 = arith.extf %232 : vector<2x128xbf16> to vector<2x128xf32>
    %234 = arith.truncf %208 : vector<2x32xf32> to vector<2x32xbf16>
    %cst_46 = arith.constant dense<0.000000e+00> : vector<2x128xf32>
    %235 = tpu.matmul %234, %3, %cst_46 {dimension_numbers = #tpu.dot_dimension_numbers<[1], [0], [0], [1], [0, 0, 1, 1], [], []>} : vector<2x32xbf16>, vector<32x128xbf16>, vector<2x128xf32> -> vector<2x128xf32>
    %236 = arith.addf %233, %235 : vector<2x128xf32>
    %237 = vector.extract_strided_slice %236 {offsets = [0, 0], sizes = [2, 96], strides = [1, 1]} : vector<2x128xf32> to vector<2x96xf32>
    %238 = arith.negf %237 : vector<2x96xf32>
    %239 = math.exp %238 : vector<2x96xf32>
    %cst_47 = arith.constant 1.000000e+00 : f32
    %240 = vector.broadcast %cst_47 : f32 to vector<2x96xf32>
    %241 = arith.addf %240, %239 : vector<2x96xf32>
    %242 = arith.divf %240, %241 : vector<2x96xf32>
    %243 = vector.extract_strided_slice %242 {offsets = [0, 0], sizes = [2, 32], strides = [1, 1]} : vector<2x96xf32> to vector<2x32xf32>
    %244 = vector.extract_strided_slice %242 {offsets = [0, 32], sizes = [2, 32], strides = [1, 1]} : vector<2x96xf32> to vector<2x32xf32>
    %245 = vector.extract_strided_slice %242 {offsets = [0, 64], sizes = [2, 32], strides = [1, 1]} : vector<2x96xf32> to vector<2x32xf32>
    %246 = vector.extract_strided_slice %236 {offsets = [0, 96], sizes = [2, 32], strides = [1, 1]} : vector<2x128xf32> to vector<2x32xf32>
    %247 = math.tanh %246 : vector<2x32xf32>
    %248 = arith.mulf %244, %206 : vector<2x32xf32>
    %249 = arith.mulf %243, %247 : vector<2x32xf32>
    %250 = arith.addf %248, %249 : vector<2x32xf32>
    %251 = math.tanh %250 : vector<2x32xf32>
    %252 = arith.mulf %245, %251 : vector<2x32xf32>
    %253 = tpu.concatenate %252, %229 in 1 : vector<2x32xf32>, vector<2x32xf32> -> vector<2x64xf32>
    %254 = arith.truncf %253 : vector<2x64xf32> to vector<2x64xbf16>
    %cst_48 = arith.constant dense<0.000000e+00> : vector<2x128xf32>
    %255 = tpu.matmul %254, %4, %cst_48 {dimension_numbers = #tpu.dot_dimension_numbers<[1], [0], [0], [1], [0, 0, 1, 1], [], []>} : vector<2x64xbf16>, vector<64x128xbf16>, vector<2x128xf32> -> vector<2x128xf32>
    %256 = vector.broadcast %5 : vector<1x128xf32> to vector<2x128xf32>
    %257 = arith.addf %255, %256 : vector<2x128xf32>
    %258 = vector.extract_strided_slice %257 {offsets = [0, 0], sizes = [2, 96], strides = [1, 1]} : vector<2x128xf32> to vector<2x96xf32>
    %259 = arith.negf %258 : vector<2x96xf32>
    %260 = math.exp %259 : vector<2x96xf32>
    %cst_49 = arith.constant 1.000000e+00 : f32
    %261 = vector.broadcast %cst_49 : f32 to vector<2x96xf32>
    %262 = arith.addf %261, %260 : vector<2x96xf32>
    %263 = arith.divf %261, %262 : vector<2x96xf32>
    %264 = vector.extract_strided_slice %263 {offsets = [0, 0], sizes = [2, 32], strides = [1, 1]} : vector<2x96xf32> to vector<2x32xf32>
    %265 = vector.extract_strided_slice %263 {offsets = [0, 32], sizes = [2, 32], strides = [1, 1]} : vector<2x96xf32> to vector<2x32xf32>
    %266 = vector.extract_strided_slice %263 {offsets = [0, 64], sizes = [2, 32], strides = [1, 1]} : vector<2x96xf32> to vector<2x32xf32>
    %267 = vector.extract_strided_slice %257 {offsets = [0, 96], sizes = [2, 32], strides = [1, 1]} : vector<2x128xf32> to vector<2x32xf32>
    %268 = math.tanh %267 : vector<2x32xf32>
    %269 = arith.mulf %265, %227 : vector<2x32xf32>
    %270 = arith.mulf %264, %268 : vector<2x32xf32>
    %271 = arith.addf %269, %270 : vector<2x32xf32>
    %272 = math.tanh %271 : vector<2x32xf32>
    %273 = arith.mulf %266, %272 : vector<2x32xf32>
    %c6_i32 = arith.constant 6 : i32
    %274 = arith.index_cast %c6_i32 : i32 to index
    %c0_50 = arith.constant 0 : index
    %c0_51 = arith.constant 0 : index
    %275 = vector.load %arg2[%274, %c0_50, %c0_51] : memref<8x2x128xbf16, #tpu.memory_space<vmem>>, vector<1x2x128xbf16>
    %276 = vector.shape_cast %275 : vector<1x2x128xbf16> to vector<2x128xbf16>
    %277 = arith.extf %276 : vector<2x128xbf16> to vector<2x128xf32>
    %278 = arith.truncf %252 : vector<2x32xf32> to vector<2x32xbf16>
    %cst_52 = arith.constant dense<0.000000e+00> : vector<2x128xf32>
    %279 = tpu.matmul %278, %3, %cst_52 {dimension_numbers = #tpu.dot_dimension_numbers<[1], [0], [0], [1], [0, 0, 1, 1], [], []>} : vector<2x32xbf16>, vector<32x128xbf16>, vector<2x128xf32> -> vector<2x128xf32>
    %280 = arith.addf %277, %279 : vector<2x128xf32>
    %281 = vector.extract_strided_slice %280 {offsets = [0, 0], sizes = [2, 96], strides = [1, 1]} : vector<2x128xf32> to vector<2x96xf32>
    %282 = arith.negf %281 : vector<2x96xf32>
    %283 = math.exp %282 : vector<2x96xf32>
    %cst_53 = arith.constant 1.000000e+00 : f32
    %284 = vector.broadcast %cst_53 : f32 to vector<2x96xf32>
    %285 = arith.addf %284, %283 : vector<2x96xf32>
    %286 = arith.divf %284, %285 : vector<2x96xf32>
    %287 = vector.extract_strided_slice %286 {offsets = [0, 0], sizes = [2, 32], strides = [1, 1]} : vector<2x96xf32> to vector<2x32xf32>
    %288 = vector.extract_strided_slice %286 {offsets = [0, 32], sizes = [2, 32], strides = [1, 1]} : vector<2x96xf32> to vector<2x32xf32>
    %289 = vector.extract_strided_slice %286 {offsets = [0, 64], sizes = [2, 32], strides = [1, 1]} : vector<2x96xf32> to vector<2x32xf32>
    %290 = vector.extract_strided_slice %280 {offsets = [0, 96], sizes = [2, 32], strides = [1, 1]} : vector<2x128xf32> to vector<2x32xf32>
    %291 = math.tanh %290 : vector<2x32xf32>
    %292 = arith.mulf %288, %250 : vector<2x32xf32>
    %293 = arith.mulf %287, %291 : vector<2x32xf32>
    %294 = arith.addf %292, %293 : vector<2x32xf32>
    %295 = math.tanh %294 : vector<2x32xf32>
    %296 = arith.mulf %289, %295 : vector<2x32xf32>
    %297 = tpu.concatenate %296, %273 in 1 : vector<2x32xf32>, vector<2x32xf32> -> vector<2x64xf32>
    %298 = arith.truncf %297 : vector<2x64xf32> to vector<2x64xbf16>
    %cst_54 = arith.constant dense<0.000000e+00> : vector<2x128xf32>
    %299 = tpu.matmul %298, %4, %cst_54 {dimension_numbers = #tpu.dot_dimension_numbers<[1], [0], [0], [1], [0, 0, 1, 1], [], []>} : vector<2x64xbf16>, vector<64x128xbf16>, vector<2x128xf32> -> vector<2x128xf32>
    %300 = vector.broadcast %5 : vector<1x128xf32> to vector<2x128xf32>
    %301 = arith.addf %299, %300 : vector<2x128xf32>
    %302 = vector.extract_strided_slice %301 {offsets = [0, 0], sizes = [2, 96], strides = [1, 1]} : vector<2x128xf32> to vector<2x96xf32>
    %303 = arith.negf %302 : vector<2x96xf32>
    %304 = math.exp %303 : vector<2x96xf32>
    %cst_55 = arith.constant 1.000000e+00 : f32
    %305 = vector.broadcast %cst_55 : f32 to vector<2x96xf32>
    %306 = arith.addf %305, %304 : vector<2x96xf32>
    %307 = arith.divf %305, %306 : vector<2x96xf32>
    %308 = vector.extract_strided_slice %307 {offsets = [0, 0], sizes = [2, 32], strides = [1, 1]} : vector<2x96xf32> to vector<2x32xf32>
    %309 = vector.extract_strided_slice %307 {offsets = [0, 32], sizes = [2, 32], strides = [1, 1]} : vector<2x96xf32> to vector<2x32xf32>
    %310 = vector.extract_strided_slice %307 {offsets = [0, 64], sizes = [2, 32], strides = [1, 1]} : vector<2x96xf32> to vector<2x32xf32>
    %311 = vector.extract_strided_slice %301 {offsets = [0, 96], sizes = [2, 32], strides = [1, 1]} : vector<2x128xf32> to vector<2x32xf32>
    %312 = math.tanh %311 : vector<2x32xf32>
    %313 = arith.mulf %309, %271 : vector<2x32xf32>
    %314 = arith.mulf %308, %312 : vector<2x32xf32>
    %315 = arith.addf %313, %314 : vector<2x32xf32>
    %316 = math.tanh %315 : vector<2x32xf32>
    %317 = arith.mulf %310, %316 : vector<2x32xf32>
    %c7_i32 = arith.constant 7 : i32
    %318 = arith.index_cast %c7_i32 : i32 to index
    %c0_56 = arith.constant 0 : index
    %c0_57 = arith.constant 0 : index
    %319 = vector.load %arg2[%318, %c0_56, %c0_57] : memref<8x2x128xbf16, #tpu.memory_space<vmem>>, vector<1x2x128xbf16>
    %320 = vector.shape_cast %319 : vector<1x2x128xbf16> to vector<2x128xbf16>
    %321 = arith.extf %320 : vector<2x128xbf16> to vector<2x128xf32>
    %322 = arith.truncf %296 : vector<2x32xf32> to vector<2x32xbf16>
    %cst_58 = arith.constant dense<0.000000e+00> : vector<2x128xf32>
    %323 = tpu.matmul %322, %3, %cst_58 {dimension_numbers = #tpu.dot_dimension_numbers<[1], [0], [0], [1], [0, 0, 1, 1], [], []>} : vector<2x32xbf16>, vector<32x128xbf16>, vector<2x128xf32> -> vector<2x128xf32>
    %324 = arith.addf %321, %323 : vector<2x128xf32>
    %325 = vector.extract_strided_slice %324 {offsets = [0, 0], sizes = [2, 96], strides = [1, 1]} : vector<2x128xf32> to vector<2x96xf32>
    %326 = arith.negf %325 : vector<2x96xf32>
    %327 = math.exp %326 : vector<2x96xf32>
    %cst_59 = arith.constant 1.000000e+00 : f32
    %328 = vector.broadcast %cst_59 : f32 to vector<2x96xf32>
    %329 = arith.addf %328, %327 : vector<2x96xf32>
    %330 = arith.divf %328, %329 : vector<2x96xf32>
    %331 = vector.extract_strided_slice %330 {offsets = [0, 0], sizes = [2, 32], strides = [1, 1]} : vector<2x96xf32> to vector<2x32xf32>
    %332 = vector.extract_strided_slice %330 {offsets = [0, 32], sizes = [2, 32], strides = [1, 1]} : vector<2x96xf32> to vector<2x32xf32>
    %333 = vector.extract_strided_slice %330 {offsets = [0, 64], sizes = [2, 32], strides = [1, 1]} : vector<2x96xf32> to vector<2x32xf32>
    %334 = vector.extract_strided_slice %324 {offsets = [0, 96], sizes = [2, 32], strides = [1, 1]} : vector<2x128xf32> to vector<2x32xf32>
    %335 = math.tanh %334 : vector<2x32xf32>
    %336 = arith.mulf %332, %294 : vector<2x32xf32>
    %337 = arith.mulf %331, %335 : vector<2x32xf32>
    %338 = arith.addf %336, %337 : vector<2x32xf32>
    %339 = math.tanh %338 : vector<2x32xf32>
    %340 = arith.mulf %333, %339 : vector<2x32xf32>
    %341 = tpu.concatenate %340, %317 in 1 : vector<2x32xf32>, vector<2x32xf32> -> vector<2x64xf32>
    %342 = arith.truncf %341 : vector<2x64xf32> to vector<2x64xbf16>
    %cst_60 = arith.constant dense<0.000000e+00> : vector<2x128xf32>
    %343 = tpu.matmul %342, %4, %cst_60 {dimension_numbers = #tpu.dot_dimension_numbers<[1], [0], [0], [1], [0, 0, 1, 1], [], []>} : vector<2x64xbf16>, vector<64x128xbf16>, vector<2x128xf32> -> vector<2x128xf32>
    %344 = vector.broadcast %5 : vector<1x128xf32> to vector<2x128xf32>
    %345 = arith.addf %343, %344 : vector<2x128xf32>
    %346 = vector.extract_strided_slice %345 {offsets = [0, 0], sizes = [2, 96], strides = [1, 1]} : vector<2x128xf32> to vector<2x96xf32>
    %347 = arith.negf %346 : vector<2x96xf32>
    %348 = math.exp %347 : vector<2x96xf32>
    %cst_61 = arith.constant 1.000000e+00 : f32
    %349 = vector.broadcast %cst_61 : f32 to vector<2x96xf32>
    %350 = arith.addf %349, %348 : vector<2x96xf32>
    %351 = arith.divf %349, %350 : vector<2x96xf32>
    %352 = vector.extract_strided_slice %351 {offsets = [0, 0], sizes = [2, 32], strides = [1, 1]} : vector<2x96xf32> to vector<2x32xf32>
    %353 = vector.extract_strided_slice %351 {offsets = [0, 32], sizes = [2, 32], strides = [1, 1]} : vector<2x96xf32> to vector<2x32xf32>
    %354 = vector.extract_strided_slice %351 {offsets = [0, 64], sizes = [2, 32], strides = [1, 1]} : vector<2x96xf32> to vector<2x32xf32>
    %355 = vector.extract_strided_slice %345 {offsets = [0, 96], sizes = [2, 32], strides = [1, 1]} : vector<2x128xf32> to vector<2x32xf32>
    %356 = math.tanh %355 : vector<2x32xf32>
    %357 = arith.mulf %353, %315 : vector<2x32xf32>
    %358 = arith.mulf %352, %356 : vector<2x32xf32>
    %359 = arith.addf %357, %358 : vector<2x32xf32>
    %360 = math.tanh %359 : vector<2x32xf32>
    %361 = arith.mulf %354, %360 : vector<2x32xf32>
    %c8_i32 = arith.constant 8 : i32
    %c0_62 = arith.constant 0 : index
    %c0_63 = arith.constant 0 : index
    %362 = vector.load %arg9[%c0_62, %c0_63] : memref<2x32xf32, #tpu.memory_space<vmem>>, vector<2x32xf32>
    tpu.vector_store %arg9[%c0_62, %c0_63], %340 {strides = array<i32>} : memref<2x32xf32, #tpu.memory_space<vmem>>, vector<2x32xf32>,
    %c0_64 = arith.constant 0 : index
    %c0_65 = arith.constant 0 : index
    %363 = vector.load %arg10[%c0_64, %c0_65] : memref<2x32xf32, #tpu.memory_space<vmem>>, vector<2x32xf32>
    tpu.vector_store %arg10[%c0_64, %c0_65], %338 {strides = array<i32>} : memref<2x32xf32, #tpu.memory_space<vmem>>, vector<2x32xf32>,
    %c0_66 = arith.constant 0 : index
    %c0_67 = arith.constant 0 : index
    %364 = vector.load %arg11[%c0_66, %c0_67] : memref<2x32xf32, #tpu.memory_space<vmem>>, vector<2x32xf32>
    tpu.vector_store %arg11[%c0_66, %c0_67], %361 {strides = array<i32>} : memref<2x32xf32, #tpu.memory_space<vmem>>, vector<2x32xf32>,
    %c0_68 = arith.constant 0 : index
    %c0_69 = arith.constant 0 : index
    %365 = vector.load %arg12[%c0_68, %c0_69] : memref<2x32xf32, #tpu.memory_space<vmem>>, vector<2x32xf32>
    tpu.vector_store %arg12[%c0_68, %c0_69], %359 {strides = array<i32>} : memref<2x32xf32, #tpu.memory_space<vmem>>, vector<2x32xf32>,
    %c0_i32_70 = arith.constant 0 : i32
    %366 = arith.cmpi eq, %arg1, %c0_i32_70 : i32
    %367 = arith.extui %366 : i1 to i32
    %c0_i32_71 = arith.constant 0 : i32
    %368 = arith.cmpi ne, %367, %c0_i32_71 : i32
    scf.if %368 {
      %c0_72 = arith.constant 0 : index
      %c0_73 = arith.constant 0 : index
      %369 = vector.load %arg6[%c0_72, %c0_73] : memref<1x32xf32, #tpu.memory_space<vmem>>, vector<1x32xf32>
      %370 = vector.broadcast %369 : vector<1x32xf32> to vector<2x32xf32>
      %371 = arith.mulf %361, %370 : vector<2x32xf32>
      %cst_74 = arith.constant dense<0.000000e+00> : vector<2xf32>
      %372 = vector.multi_reduction <add>, %371, %cst_74 [1] : vector<2x32xf32> to vector<2xf32>
      %373 = vector.shape_cast %372 : vector<2xf32> to vector<2x1xf32>
      %c0_75 = arith.constant 0 : index
      %c0_76 = arith.constant 0 : index
      %374 = vector.load %arg7[%c0_75, %c0_76] : memref<1x1xf32, #tpu.memory_space<vmem>>, vector<1x1xf32>
      %375 = vector.broadcast %374 : vector<1x1xf32> to vector<2x1xf32>
      %376 = arith.addf %373, %375 : vector<2x1xf32>
      %c0_77 = arith.constant 0 : index
      %c0_78 = arith.constant 0 : index
      %377 = vector.load %arg8[%c0_77, %c0_78] : memref<2x1xf32, #tpu.memory_space<vmem>>, vector<2x1xf32>
      tpu.vector_store %arg8[%c0_77, %c0_78], %376 {strides = array<i32>} : memref<2x1xf32, #tpu.memory_space<vmem>>, vector<2x1xf32>,
    } else {
    }
    return
  }
  func.func @transform_0(%arg0: i32, %arg1: i32) -> (i32, i32, i32) {
    %c0_i32 = arith.constant 0 : i32
    %c0_i32_0 = arith.constant 0 : i32
    return %arg1, %arg0, %c0_i32 : i32, i32, i32
  }
  func.func @transform_1(%arg0: i32, %arg1: i32) -> (i32, i32) {
    %c0_i32 = arith.constant 0 : i32
    %c0_i32_0 = arith.constant 0 : i32
    %c0_i32_1 = arith.constant 0 : i32
    return %c0_i32, %c0_i32_0 : i32, i32
  }
  func.func @transform_2(%arg0: i32, %arg1: i32) -> (i32, i32) {
    %c0_i32 = arith.constant 0 : i32
    %c0_i32_0 = arith.constant 0 : i32
    %c0_i32_1 = arith.constant 0 : i32
    return %c0_i32, %c0_i32_0 : i32, i32
  }
  func.func @transform_3(%arg0: i32, %arg1: i32) -> (i32, i32) {
    %c0_i32 = arith.constant 0 : i32
    %c0_i32_0 = arith.constant 0 : i32
    %c0_i32_1 = arith.constant 0 : i32
    return %c0_i32, %c0_i32_0 : i32, i32
  }
  func.func @transform_4(%arg0: i32, %arg1: i32) -> (i32, i32) {
    %c0_i32 = arith.constant 0 : i32
    %c0_i32_0 = arith.constant 0 : i32
    %c0_i32_1 = arith.constant 0 : i32
    return %c0_i32, %c0_i32_0 : i32, i32
  }
  func.func @transform_5(%arg0: i32, %arg1: i32) -> (i32, i32) {
    %c0_i32 = arith.constant 0 : i32
    %c0_i32_0 = arith.constant 0 : i32
    %c0_i32_1 = arith.constant 0 : i32
    return %c0_i32, %c0_i32_0 : i32, i32
  }
  func.func @transform_6(%arg0: i32, %arg1: i32) -> (i32, i32) {
    %c0_i32 = arith.constant 0 : i32
    %c0_i32_0 = arith.constant 0 : i32
    return %arg0, %c0_i32 : i32, i32
  }
}

</mosaic_0001>

<bundles_post_ra>
// kernel: lstm_model_forward.2
= control target key start
LH: loop header
LB: loop body
LE: loop exit
PB: predicated region body
PF: predicated region fallthrough
CT: control target
= control target key end

     0   :  { %v128_v0 = vmov 0.0   ;;  %vm129_vm0 = vmmov 0   ;;  %vm41_vm1 = vcmask 261120   ;;  %s168_s1 = inlined_call_operand.vmem [shape: bf16[32,128], index: 1, kind: input, shape index: {}]   ;;  %s169_s0 = inlined_call_operand.vmem [shape: f32[16,32], index: 0, kind: input, shape index: {}]   ;;  %s170_s2 = inlined_call_operand.vmem [shape: f32[1,128], index: 2, kind: input, shape index: {}]   ;;  %s171_s3 = inlined_call_operand.vmem [shape: bf16[16,128], index: 3, kind: output, shape index: {}]  }
   0x1   :  { %116 = vmatprep.subr.bf16.mxu0 %v128_v0  ;;  %v126_v1 = vld [vmem:[%s168_s1 + $0x8] sm:$0xff]   ;;  %120 = vmatprep.mubr.msk.bf16.mxu0 %vm129_vm0, %v128_v0  ;;  %v127_v2 = vld [vmem:[%s168_s1] sm:$0xff]  }
   0x2   :  { %117 = vmatpush3.bf16.msra.mxu0 %v126_v1  ;;  %v15_v3 = vld [vmem:[%s169_s0] sm:$0xff]  ;;  %v16_v4 = vld [vmem:[%s169_s0 + $0x8] sm:$0xff] }
   0x3   :  { %118 = vmatprep.subr.bf16.mxu0 %v128_v0  ;;  %v17_v5 = vpack.c.bf16 %v16_v4, %v15_v3  ;;  %v100_v7 = vld [vmem:[%s170_s2] ss:$0 sm:$0xff] }
   0x6   :  { %119 = vmatpush3.bf16.msra.mxu0 %v127_v2 }
   0x9   :  { %121 = vmatmul.mubr.msk.bf16.vlgmr.msra.gmra.mxu0 %vm41_vm1, %v17_v5 }
  0xc9   :  { %v79_v6 = vpop.f32.mrf.mxu0 }
  0xca   :  { %v80_v10 = vadd.f32 %v100_v7, %v79_v6 }
  0xcb   :  { %v122_v8 = vpop.f32.mrf.mxu0 }
  0xcd   :  { %v82_v9 = vpop.f32.mrf.mxu0 }
  0xce   :  { %v83_v11 = vadd.f32 %v100_v7, %v82_v9 }
  0xcf   :  { %v123_v12 = vpop.f32.mrf.mxu0 }
  0xd0   :  { %v111_v13 = vpack.c.bf16 %v83_v11, %v80_v10 }
  0xd2   :  { %112 = vst [vmem:[%s171_s3] sm:$0xff] %v111_v13  }

// kernel: lstm_model_forward.3
= control target key start
LH: loop header
LB: loop body
LE: loop exit
PB: predicated region body
PF: predicated region fallthrough
CT: control target
= control target key end

     0   :  { %vm30_vm0 = vcmask 254976   ;;  %v1853_v0 = vmov 0.0   ;;  %vm1854_vm1 = vmmov 0   ;;  %vm67_vm2 = vcmask 261120   ;;  %s1855_s26 = smov 32   ;;  %s1857_s11 = smov 64   ;;  %s2282_s1 = inlined_call_operand.vmem [shape: bf16[32,128], index: 1, kind: input, shape index: {}]   ;;  %s2283_s0 = inlined_call_operand.vmem [shape: bf16[8,2,128], index: 0, kind: input, shape index: {}]   ;;  %s2284_s2 = inlined_call_operand.vmem [shape: bf16[64,128], index: 2, kind: input, shape index: {}]   ;;  %s2285_s3 = inlined_call_operand.vmem [shape: f32[1,128], index: 3, kind: input, shape index: {}]   ;;  %s2286_s4 = inlined_call_operand.vmem [shape: f32[1,32], index: 4, kind: input, shape index: {}]   ;;  %s2287_s5 = inlined_call_operand.<no memory space> [shape: f32[1,1], index: 5, kind: input, shape index: {}]   ;;  %s2288_s6 = inlined_call_operand.vmem [shape: f32[2,1], index: 6, kind: output, shape index: {}]  }
   0x1   :  { %1550 = vmatprep.subr.bf16.mxu1 %v1853_v0  ;;  %v1898_v1 = vld [vmem:[%s2282_s1 + $0x8] sm:$0xff]   ;;  %1554 = vmatprep.mubr.msk.bf16.mxu1 %vm1854_vm1, %v1853_v0  ;;  %31 = vst.msk [vmem:[#allocation2] sm:$0x3] %vm30_vm0, %v1853_v0  ;;  %32 = vst.msk [vmem:[#allocation3] sm:$0x3] %vm30_vm0, %v1853_v0  ;;  %v1917_v2 = vld [vmem:[%s2282_s1] sm:$0xff]   ;;  %v151_v32 = vlaneseq }
   0x2   :  { %33 = vst.msk [vmem:[#allocation4] sm:$0x3] %vm30_vm0, %v1853_v0  ;;  %34 = vst.msk [vmem:[#allocation5] sm:$0x3] %vm30_vm0, %v1853_v0  ;;  %1570 = vmatprep.subr.bf16.mxu0 %v1853_v0  ;;  %1574 = vmatprep.mubr.msk.bf16.mxu0 %vm1854_vm1, %v1853_v0  ;;  %v52_v5 = vld [vmem:[%s2283_s0] sm:$0x1] }
   0x3   :  { %1551 = vmatpush3.bf16.msra.mxu1 %v1898_v1  ;;  %1571 = vmatpush3.bf16.msra.mxu0 %v1898_v1  ;;  %v53_v6 = vunpack.c.l.bf16 %v52_v5  ;;  %v1941_v24 = vld [vmem:[%s2284_s2 + $0x18] sm:$0xff]   ;;  %v1947_v25 = vld [vmem:[%s2284_s2 + $0x10] sm:$0xff]   ;;  %v1955_v28 = vld [vmem:[%s2284_s2 + $0x8] sm:$0xff]   ;;  %v1856_v30 = vmov 1983009808   ;;  %v152_v34 = vshrl.u32 %v151_v32, 7 }
   0x4   :  { %1552 = vmatprep.subr.bf16.mxu1 %v1853_v0  ;;  %1572 = vmatprep.subr.bf16.mxu0 %v1853_v0  ;;  %v1964_v29 = vld [vmem:[%s2284_s2] sm:$0xff]   ;;  %v149_v31 = vunpack.c.l.s4 %v1856_v30  ;;  %vm194_vm3 = vcmask 523264   ;;  %s1858_s16 = smov 96   ;;  %vm1431_vm4 = vcmask 1024  }
   0x5   :  { %v1449_v45 = vld [vmem:[%s2283_s0 + $0x1] sm:$0x1]  ;;  %v1998_v46 = vld [vmem:[%s2285_s3] ss:$0 sm:$0xff] }
   0x6   :  { %v150_v33 = vunpack.c.0.s8 %v149_v31  ;;  %v268_v47 = vunpack.c.l.bf16 %v1449_v45 }
   0x7   :  { %1553 = vmatpush3.bf16.msra.mxu1 %v1917_v2  ;;  %1573 = vmatpush3.bf16.msra.mxu0 %v1917_v2 }
   0x8   :  { %v48_v3 = vld [vmem:[#allocation2] sm:$0x3]  ;;  %1558 = vmatprep.subr.bf16.mxu1 %v1853_v0  ;;  %1578 = vmatprep.subr.bf16.mxu0 %v1853_v0  ;;  %v1441_v13 = vld.sshfl [vmem:[#allocation3] sm:$0x3 pattern:$0x76325410]  ;;  %v1968_v35 = vsub.s32 %v150_v33, %v152_v34 }
   0x9   :  { %v54_v4 = vpack.c.bf16 %v48_v3, %v48_v3  ;;  %v50_v27 = vld [vmem:[#allocation4] sm:$0x3]  ;;  %v51_v60 = vld [vmem:[#allocation5] sm:$0x3] }
   0xb   :  { %1555 = vmatmul.mubr.msk.bf16.vlgmr.msra.gmra.mxu1 %vm67_vm2, %v54_v4 }
   0xc   :  { %1566 = vmatprep.mubr.msk.bf16.mxu1 %vm1854_vm1, %v1853_v0  ;;  %1559 = vmatpush3.bf16.msra.mxu1 %v1941_v24 }
   0xd   :  { %1560 = vmatprep.subr.bf16.mxu1 %v1853_v0 }
  0x10   :  { %1561 = vmatpush3.bf16.msra.mxu1 %v1947_v25 }
  0x11   :  { %1562 = vmatprep.subr.bf16.mxu1 %v1853_v0 }
  0x14   :  { %1563 = vmatpush3.bf16.msra.mxu1 %v1955_v28 }
  0x15   :  { %1564 = vmatprep.subr.bf16.mxu1 %v1853_v0 }
  0x18   :  { %1565 = vmatpush3.bf16.msra.mxu1 %v1964_v29 }
  0x19   :  { %1590 = vmatprep.subr.bf16.mxu1 %v1853_v0 }
  0xcb   :  { %v105_v7 = vpop.f32.mrf.mxu1 }
  0xcc   :  { %v111_v8 = vadd.f32 %v105_v7, %v53_v6 }
  0xcd   :  { %v1556_v9 = vpop.f32.mrf.mxu1 }
  0xce   :  { %1722 = vtanh.f32 %v111_v8  ;;  %v1440_v14 = vmul.f32 -1.442695, %v111_v8 }
  0xcf   :  { %v108_v10 = vpop.f32.mrf.mxu1 }
  0xd0   :  { %1724 = vpow2.f32 %v1440_v14 }
  0xd1   :  { %v1557_v11 = vpop.f32.mrf.mxu1 }
  0xdb   :  { %v1723_v12 = vpop.eup %1722 }
  0xdc   :  { %132 = vrot.lane.b32.xlu0 %v1723_v12, %s1855_s26 }
  0xdd   :  { %v1725_v15 = vpop.eup %1724 }
  0xde   :  { %v115_v16 = vadd.f32 1.0, %v1725_v15 }
  0xe0   :  { %127 = vrot.lane.b32.xlu0 %v1441_v13, %s1855_s26  ;;  %1726 = vrcp.f32 %v115_v16 }
  0xed   :  { %v1727_v17 = vpop.eup %1726 }
 0x14e   :  { %v133_v18 = vpop.permute.xlu0 %132 }
 0x14f   :  { %v135_v19 = vmul.f32 %v1727_v17, %v133_v18 }
 0x151   :  { %137 = vrot.lane.b32.xlu1 %v135_v19, %s1855_s26 }
 0x152   :  { %v128_v20 = vpop.permute.xlu0 %127 }
 0x153   :  { %v130_v21 = vmul.f32 %v1727_v17, %v128_v20 }
 0x1c3   :  { %v138_v22 = vpop.permute.xlu1 %137 }
 0x1c4   :  { %v1935_v23 = vadd.f32 %v138_v22, %v130_v21 }
 0x1c6   :  { %1728 = vtanh.f32 %v1935_v23 }
 0x1d3   :  { %v1729_v26 = vpop.eup %1728 }
 0x1d4   :  { %143 = vrot.lane.b32.xlu1 %v1729_v26, %s1855_s26 }
 0x1d8   :  { %159 = vrot.lane.b32.xlu1 %v50_v27, %s1855_s26 }
 0x246   :  { %v144_v36 = vpop.permute.xlu1 %143 }
 0x247   :  { %v146_v37 = vmul.f32 %v1727_v17, %v144_v36 }
 0x249   :  { %v154_v38 = vrot.slane %v146_v37, %v1968_v35  ;;  %v269_v39 = vpack.c.bf16 %v146_v37, %v146_v37  ;;  %v1454_v37 = vld [vmem:[%s2283_s0 + $0x2] sm:$0x1] }
 0x24a   :  { %v160_v40 = vpop.permute.xlu1 %159 }
 0x24b   :  { %155 = vrot.lane.b32.xlu0 %v154_v38, %s1857_s11  ;;  %v427_v38 = vunpack.c.l.bf16 %v1454_v37 }
 0x24f   :  { %271 = vrot.lane.b32.xlu0 %v269_v39, %s1857_s11 }
 0x2bd   :  { %v156_v41 = vpop.permute.xlu0 %155 }
 0x2be   :  { %v162_v42 = vsel %vm67_vm2, %v156_v41, %v160_v40 }
 0x2bf   :  { %v163_v43 = vpack.c.bf16 %v162_v42, %v162_v42 }
 0x2c1   :  { %v272_v44 = vpop.permute.xlu0 %271  ;;  %1567 = vmatmul.mubr.msk.bf16.vlgmr.msra.gmra.mxu1 %vm194_vm3, %v163_v43 }
 0x2c2   :  { %1575 = vmatmul.mubr.msk.bf16.vlgmr.msra.gmra.mxu0 %vm67_vm2, %v272_v44  ;;  %1591 = vmatpush3.bf16.msra.mxu1 %v1898_v1 }
 0x2c3   :  { %1579 = vmatpush3.bf16.msra.mxu0 %v1941_v24  ;;  %1592 = vmatprep.subr.bf16.mxu1 %v1853_v0 }
 0x2c4   :  { %1580 = vmatprep.subr.bf16.mxu0 %v1853_v0  ;;  %1586 = vmatprep.mubr.msk.bf16.mxu0 %vm1854_vm1, %v1853_v0 }
 0x2c5   :  { %1594 = vmatprep.mubr.msk.bf16.mxu1 %vm1854_vm1, %v1853_v0 }
 0x2c6   :  { %1593 = vmatpush3.bf16.msra.mxu1 %v1917_v2 }
 0x2c7   :  { %1581 = vmatpush3.bf16.msra.mxu0 %v1947_v25  ;;  %1598 = vmatprep.subr.bf16.mxu1 %v1853_v0 }
 0x2c8   :  { %1582 = vmatprep.subr.bf16.mxu0 %v1853_v0 }
 0x2cb   :  { %1583 = vmatpush3.bf16.msra.mxu0 %v1955_v28 }
 0x2cc   :  { %1584 = vmatprep.subr.bf16.mxu0 %v1853_v0 }
 0x2cf   :  { %1585 = vmatpush3.bf16.msra.mxu0 %v1964_v29 }
 0x2d0   :  { %1610 = vmatprep.subr.bf16.mxu0 %v1853_v0 }
 0x381   :  { %v232_v48 = vpop.f32.mrf.mxu1 }
 0x382   :  { %v233_v49 = vadd.f32 %v1998_v46, %v232_v48  ;;  %v310_v50 = vpop.f32.mrf.mxu0 }
 0x383   :  { %v316_v51 = vadd.f32 %v310_v50, %v268_v47  ;;  %v1568_v52 = vpop.f32.mrf.mxu1 }
 0x384   :  { %1730 = vtanh.f32 %v233_v49  ;;  %v1576_v53 = vpop.f32.mrf.mxu0  ;;  %v1448_v61 = vmul.f32 -1.442695, %v233_v49 }
 0x385   :  { %1732 = vtanh.f32 %v316_v51  ;;  %v235_v54 = vpop.f32.mrf.mxu1  ;;  %v1451_v62 = vmul.f32 -1.442695, %v316_v51 }
 0x386   :  { %v313_v55 = vpop.f32.mrf.mxu0  ;;  %1734 = vpow2.f32 %v1448_v61 }
 0x387   :  { %v1569_v56 = vpop.f32.mrf.mxu1  ;;  %1736 = vpow2.f32 %v1451_v62 }
 0x388   :  { %v1577_v57 = vpop.f32.mrf.mxu0 }
 0x391   :  { %v1731_v58 = vpop.eup %1730 }
 0x392   :  { %v1733_v59 = vpop.eup %1732  ;;  %251 = vrot.lane.b32.xlu0 %v1731_v58, %s1855_s26 }
 0x393   :  { %326 = vrot.lane.b32.xlu1 %v1733_v59, %s1855_s26  ;;  %v1735_v63 = vpop.eup %1734 }
 0x394   :  { %v1737_v3 = vpop.eup %1736  ;;  %v241_v4 = vadd.f32 1.0, %v1735_v63 }
 0x395   :  { %v320_v5 = vadd.f32 1.0, %v1737_v3 }
 0x396   :  { %1738 = vrcp.f32 %v241_v4 }
 0x397   :  { %246 = vrot.lane.b32.xlu1 %v51_v60, %s1855_s26  ;;  %1740 = vrcp.f32 %v320_v5 }
 0x3a3   :  { %v1739_v6 = vpop.eup %1738 }
 0x3a4   :  { %v1741_v8 = vpop.eup %1740 }
 0x3a5   :  { %v324_v15 = vmul.f32 %v1741_v8, %v1935_v23 }
 0x404   :  { %v252_v7 = vpop.permute.xlu0 %251 }
 0x405   :  { %v254_v9 = vmul.f32 %v1739_v6, %v252_v7  ;;  %v327_v10 = vpop.permute.xlu1 %326 }
 0x406   :  { %v329_v11 = vmul.f32 %v1741_v8, %v327_v10 }
 0x407   :  { %256 = vrot.lane.b32.xlu1 %v254_v9, %s1855_s26 }
 0x408   :  { %331 = vrot.lane.b32.xlu0 %v329_v11, %s1855_s26 }
 0x409   :  { %v247_v12 = vpop.permute.xlu1 %246 }
 0x40a   :  { %v249_v13 = vmul.f32 %v1739_v6, %v247_v12 }
 0x479   :  { %v257_v14 = vpop.permute.xlu1 %256 }
 0x47a   :  { %v2007_v16 = vadd.f32 %v257_v14, %v249_v13  ;;  %v332_v17 = vpop.permute.xlu0 %331 }
 0x47b   :  { %v2009_v18 = vadd.f32 %v332_v17, %v324_v15 }
 0x47c   :  { %1742 = vtanh.f32 %v2007_v16 }
 0x47d   :  { %1744 = vtanh.f32 %v2009_v18 }
 0x489   :  { %v1743_v19 = vpop.eup %1742 }
 0x48a   :  { %v1745_v20 = vpop.eup %1744  ;;  %262 = vrot.lane.b32.xlu1 %v1743_v19, %s1855_s26 }
 0x48b   :  { %337 = vrot.lane.b32.xlu0 %v1745_v20, %s1855_s26 }
 0x4fc   :  { %v263_v21 = vpop.permute.xlu1 %262 }
 0x4fd   :  { %v265_v22 = vmul.f32 %v1739_v6, %v263_v21  ;;  %v338_v26 = vpop.permute.xlu0 %337 }
 0x4fe   :  { %v340_v27 = vmul.f32 %v1741_v8, %v338_v26 }
 0x4ff   :  { %353 = vrot.lane.b32.xlu1 %v265_v22, %s1858_s16  ;;  %v1459_v22 = vld [vmem:[%s2283_s0 + $0x3] sm:$0x1] }
 0x500   :  { %v348_v23 = vrot.slane %v340_v27, %v1968_v35  ;;  %v428_v30 = vpack.c.bf16 %v340_v27, %v340_v27  ;;  %v586_v26 = vunpack.c.l.bf16 %v1459_v22 }
 0x502   :  { %349 = vrot.lane.b32.xlu0 %v348_v23, %s1857_s11 }
 0x506   :  { %430 = vrot.lane.b32.xlu0 %v428_v30, %s1857_s11 }
 0x571   :  { %v354_v31 = vpop.permute.xlu1 %353 }
 0x574   :  { %v350_v32 = vpop.permute.xlu0 %349 }
 0x575   :  { %v356_v33 = vsel %vm67_vm2, %v350_v32, %v354_v31 }
 0x576   :  { %v357_v34 = vpack.c.bf16 %v356_v33, %v356_v33 }
 0x578   :  { %v431_v36 = vpop.permute.xlu0 %430  ;;  %1587 = vmatmul.mubr.msk.bf16.vlgmr.msra.gmra.mxu0 %vm194_vm3, %v357_v34 }
 0x579   :  { %1595 = vmatmul.mubr.msk.bf16.vlgmr.msra.gmra.mxu1 %vm67_vm2, %v431_v36  ;;  %1611 = vmatpush3.bf16.msra.mxu0 %v1898_v1 }
 0x57a   :  { %1599 = vmatpush3.bf16.msra.mxu1 %v1941_v24  ;;  %1612 = vmatprep.subr.bf16.mxu0 %v1853_v0 }
 0x57b   :  { %1600 = vmatprep.subr.bf16.mxu1 %v1853_v0  ;;  %1606 = vmatprep.mubr.msk.bf16.mxu1 %vm1854_vm1, %v1853_v0 }
 0x57c   :  { %1614 = vmatprep.mubr.msk.bf16.mxu0 %vm1854_vm1, %v1853_v0 }
 0x57d   :  { %1613 = vmatpush3.bf16.msra.mxu0 %v1917_v2 }
 0x57e   :  { %1601 = vmatpush3.bf16.msra.mxu1 %v1947_v25  ;;  %1618 = vmatprep.subr.bf16.mxu0 %v1853_v0 }
 0x57f   :  { %1602 = vmatprep.subr.bf16.mxu1 %v1853_v0 }
 0x582   :  { %1603 = vmatpush3.bf16.msra.mxu1 %v1955_v28 }
 0x583   :  { %1604 = vmatprep.subr.bf16.mxu1 %v1853_v0 }
 0x586   :  { %1605 = vmatpush3.bf16.msra.mxu1 %v1964_v29 }
 0x587   :  { %1630 = vmatprep.subr.bf16.mxu1 %v1853_v0 }
 0x638   :  { %v395_v39 = vpop.f32.mrf.mxu0 }
 0x639   :  { %v396_v40 = vadd.f32 %v1998_v46, %v395_v39  ;;  %v469_v41 = vpop.f32.mrf.mxu1 }
 0x63a   :  { %v475_v42 = vadd.f32 %v469_v41, %v427_v38  ;;  %v1588_v43 = vpop.f32.mrf.mxu0 }
 0x63b   :  { %1746 = vtanh.f32 %v396_v40  ;;  %v1596_v44 = vpop.f32.mrf.mxu1  ;;  %v1453_v52 = vmul.f32 -1.442695, %v396_v40 }
 0x63c   :  { %1748 = vtanh.f32 %v475_v42  ;;  %v398_v45 = vpop.f32.mrf.mxu0  ;;  %v1456_v53 = vmul.f32 -1.442695, %v475_v42 }
 0x63d   :  { %v472_v47 = vpop.f32.mrf.mxu1  ;;  %1750 = vpow2.f32 %v1453_v52 }
 0x63e   :  { %v1589_v48 = vpop.f32.mrf.mxu0  ;;  %1752 = vpow2.f32 %v1456_v53 }
 0x63f   :  { %v1597_v49 = vpop.f32.mrf.mxu1 }
 0x648   :  { %v1747_v50 = vpop.eup %1746 }
 0x649   :  { %v1749_v51 = vpop.eup %1748  ;;  %410 = vrot.lane.b32.xlu0 %v1747_v50, %s1855_s26 }
 0x64a   :  { %485 = vrot.lane.b32.xlu1 %v1749_v51, %s1855_s26  ;;  %v1751_v54 = vpop.eup %1750 }
 0x64b   :  { %v1753_v55 = vpop.eup %1752  ;;  %v404_v56 = vadd.f32 1.0, %v1751_v54 }
 0x64c   :  { %v479_v57 = vadd.f32 1.0, %v1753_v55 }
 0x64d   :  { %1754 = vrcp.f32 %v404_v56 }
 0x64e   :  { %1756 = vrcp.f32 %v479_v57 }
 0x65a   :  { %v1755_v58 = vpop.eup %1754 }
 0x65b   :  { %v1757_v60 = vpop.eup %1756  ;;  %v408_v3 = vmul.f32 %v1755_v58, %v2007_v16 }
 0x65c   :  { %v483_v5 = vmul.f32 %v1757_v60, %v2009_v18 }
 0x6bb   :  { %v411_v59 = vpop.permute.xlu0 %410 }
 0x6bc   :  { %v413_v61 = vmul.f32 %v1755_v58, %v411_v59  ;;  %v486_v62 = vpop.permute.xlu1 %485 }
 0x6bd   :  { %v488_v63 = vmul.f32 %v1757_v60, %v486_v62 }
 0x6be   :  { %415 = vrot.lane.b32.xlu0 %v413_v61, %s1855_s26 }
 0x6bf   :  { %490 = vrot.lane.b32.xlu1 %v488_v63, %s1855_s26 }
 0x730   :  { %v416_v4 = vpop.permute.xlu0 %415 }
 0x731   :  { %v2048_v6 = vadd.f32 %v416_v4, %v408_v3  ;;  %v491_v7 = vpop.permute.xlu1 %490 }
 0x732   :  { %v2050_v8 = vadd.f32 %v491_v7, %v483_v5 }
 0x733   :  { %1758 = vtanh.f32 %v2048_v6 }
 0x734   :  { %1760 = vtanh.f32 %v2050_v8 }
 0x740   :  { %v1759_v9 = vpop.eup %1758 }
 0x741   :  { %v1761_v10 = vpop.eup %1760  ;;  %421 = vrot.lane.b32.xlu0 %v1759_v9, %s1855_s26 }
 0x742   :  { %496 = vrot.lane.b32.xlu1 %v1761_v10, %s1855_s26 }
 0x7b3   :  { %v422_v11 = vpop.permute.xlu0 %421 }
 0x7b4   :  { %v424_v12 = vmul.f32 %v1755_v58, %v422_v11  ;;  %v497_v13 = vpop.permute.xlu1 %496 }
 0x7b5   :  { %v499_v14 = vmul.f32 %v1757_v60, %v497_v13 }
 0x7b6   :  { %512 = vrot.lane.b32.xlu0 %v424_v12, %s1858_s16  ;;  %v1464_v12 = vld [vmem:[%s2283_s0 + $0x4] sm:$0x1] }
 0x7b7   :  { %v507_v15 = vrot.slane %v499_v14, %v1968_v35  ;;  %v587_v16 = vpack.c.bf16 %v499_v14, %v499_v14  ;;  %v745_v13 = vunpack.c.l.bf16 %v1464_v12 }
 0x7b9   :  { %508 = vrot.lane.b32.xlu1 %v507_v15, %s1857_s11 }
 0x7bd   :  { %589 = vrot.lane.b32.xlu1 %v587_v16, %s1857_s11 }
 0x828   :  { %v513_v17 = vpop.permute.xlu0 %512 }
 0x82b   :  { %v509_v18 = vpop.permute.xlu1 %508 }
 0x82c   :  { %v515_v19 = vsel %vm67_vm2, %v509_v18, %v513_v17 }
 0x82d   :  { %v516_v20 = vpack.c.bf16 %v515_v19, %v515_v19 }
 0x82f   :  { %1607 = vmatmul.mubr.msk.bf16.vlgmr.msra.gmra.mxu1 %vm194_vm3, %v516_v20  ;;  %v590_v21 = vpop.permute.xlu1 %589 }
 0x830   :  { %1615 = vmatmul.mubr.msk.bf16.vlgmr.msra.gmra.mxu0 %vm67_vm2, %v590_v21  ;;  %1631 = vmatpush3.bf16.msra.mxu1 %v1898_v1 }
 0x831   :  { %1619 = vmatpush3.bf16.msra.mxu0 %v1941_v24  ;;  %1632 = vmatprep.subr.bf16.mxu1 %v1853_v0 }
 0x832   :  { %1620 = vmatprep.subr.bf16.mxu0 %v1853_v0  ;;  %1626 = vmatprep.mubr.msk.bf16.mxu0 %vm1854_vm1, %v1853_v0 }
 0x833   :  { %1634 = vmatprep.mubr.msk.bf16.mxu1 %vm1854_vm1, %v1853_v0 }
 0x834   :  { %1633 = vmatpush3.bf16.msra.mxu1 %v1917_v2 }
 0x835   :  { %1621 = vmatpush3.bf16.msra.mxu0 %v1947_v25  ;;  %1638 = vmatprep.subr.bf16.mxu1 %v1853_v0 }
 0x836   :  { %1622 = vmatprep.subr.bf16.mxu0 %v1853_v0 }
 0x839   :  { %1623 = vmatpush3.bf16.msra.mxu0 %v1955_v28 }
 0x83a   :  { %1624 = vmatprep.subr.bf16.mxu0 %v1853_v0 }
 0x83d   :  { %1625 = vmatpush3.bf16.msra.mxu0 %v1964_v29 }
 0x83e   :  { %1650 = vmatprep.subr.bf16.mxu0 %v1853_v0 }
 0x8ef   :  { %v554_v27 = vpop.f32.mrf.mxu1 }
 0x8f0   :  { %v555_v23 = vadd.f32 %v1998_v46, %v554_v27  ;;  %v628_v30 = vpop.f32.mrf.mxu0 }
 0x8f1   :  { %v634_v31 = vadd.f32 %v628_v30, %v586_v26  ;;  %v1608_v32 = vpop.f32.mrf.mxu1 }
 0x8f2   :  { %1762 = vtanh.f32 %v555_v23  ;;  %v1616_v33 = vpop.f32.mrf.mxu0  ;;  %v1458_v41 = vmul.f32 -1.442695, %v555_v23 }
 0x8f3   :  { %1764 = vtanh.f32 %v634_v31  ;;  %v557_v34 = vpop.f32.mrf.mxu1  ;;  %v1461_v42 = vmul.f32 -1.442695, %v634_v31 }
 0x8f4   :  { %v631_v36 = vpop.f32.mrf.mxu0  ;;  %1766 = vpow2.f32 %v1458_v41 }
 0x8f5   :  { %v1609_v37 = vpop.f32.mrf.mxu1  ;;  %1768 = vpow2.f32 %v1461_v42 }
 0x8f6   :  { %v1617_v38 = vpop.f32.mrf.mxu0 }
 0x8ff   :  { %v1763_v39 = vpop.eup %1762 }
 0x900   :  { %v1765_v40 = vpop.eup %1764  ;;  %569 = vrot.lane.b32.xlu1 %v1763_v39, %s1855_s26 }
 0x901   :  { %644 = vrot.lane.b32.xlu0 %v1765_v40, %s1855_s26  ;;  %v1767_v43 = vpop.eup %1766 }
 0x902   :  { %v1769_v44 = vpop.eup %1768  ;;  %v563_v45 = vadd.f32 1.0, %v1767_v43 }
 0x903   :  { %v638_v47 = vadd.f32 1.0, %v1769_v44 }
 0x904   :  { %1770 = vrcp.f32 %v563_v45 }
 0x905   :  { %1772 = vrcp.f32 %v638_v47 }
 0x911   :  { %v1771_v48 = vpop.eup %1770 }
 0x912   :  { %v1773_v50 = vpop.eup %1772  ;;  %v567_v54 = vmul.f32 %v1771_v48, %v2048_v6 }
 0x913   :  { %v642_v56 = vmul.f32 %v1773_v50, %v2050_v8 }
 0x972   :  { %v570_v49 = vpop.permute.xlu1 %569 }
 0x973   :  { %v572_v51 = vmul.f32 %v1771_v48, %v570_v49  ;;  %v645_v52 = vpop.permute.xlu0 %644 }
 0x974   :  { %v647_v53 = vmul.f32 %v1773_v50, %v645_v52 }
 0x975   :  { %574 = vrot.lane.b32.xlu1 %v572_v51, %s1855_s26 }
 0x976   :  { %649 = vrot.lane.b32.xlu0 %v647_v53, %s1855_s26 }
 0x9e7   :  { %v575_v55 = vpop.permute.xlu1 %574 }
 0x9e8   :  { %v2089_v57 = vadd.f32 %v575_v55, %v567_v54  ;;  %v650_v58 = vpop.permute.xlu0 %649 }
 0x9e9   :  { %v2091_v59 = vadd.f32 %v650_v58, %v642_v56 }
 0x9ea   :  { %1774 = vtanh.f32 %v2089_v57 }
 0x9eb   :  { %1776 = vtanh.f32 %v2091_v59 }
 0x9f7   :  { %v1775_v60 = vpop.eup %1774 }
 0x9f8   :  { %v1777_v61 = vpop.eup %1776  ;;  %580 = vrot.lane.b32.xlu1 %v1775_v60, %s1855_s26 }
 0x9f9   :  { %655 = vrot.lane.b32.xlu0 %v1777_v61, %s1855_s26 }
 0xa6a   :  { %v581_v62 = vpop.permute.xlu1 %580 }
 0xa6b   :  { %v583_v63 = vmul.f32 %v1771_v48, %v581_v62  ;;  %v656_v3 = vpop.permute.xlu0 %655 }
 0xa6c   :  { %v658_v4 = vmul.f32 %v1773_v50, %v656_v3 }
 0xa6d   :  { %671 = vrot.lane.b32.xlu1 %v583_v63, %s1858_s16  ;;  %v1469_v63 = vld [vmem:[%s2283_s0 + $0x5] sm:$0x1] }
 0xa6e   :  { %v666_v5 = vrot.slane %v658_v4, %v1968_v35  ;;  %v746_v6 = vpack.c.bf16 %v658_v4, %v658_v4  ;;  %v904_v3 = vunpack.c.l.bf16 %v1469_v63 }
 0xa70   :  { %667 = vrot.lane.b32.xlu0 %v666_v5, %s1857_s11 }
 0xa74   :  { %748 = vrot.lane.b32.xlu0 %v746_v6, %s1857_s11 }
 0xadf   :  { %v672_v7 = vpop.permute.xlu1 %671 }
 0xae2   :  { %v668_v8 = vpop.permute.xlu0 %667 }
 0xae3   :  { %v674_v9 = vsel %vm67_vm2, %v668_v8, %v672_v7 }
 0xae4   :  { %v675_v10 = vpack.c.bf16 %v674_v9, %v674_v9 }
 0xae6   :  { %v749_v11 = vpop.permute.xlu0 %748  ;;  %1627 = vmatmul.mubr.msk.bf16.vlgmr.msra.gmra.mxu0 %vm194_vm3, %v675_v10 }
 0xae7   :  { %1635 = vmatmul.mubr.msk.bf16.vlgmr.msra.gmra.mxu1 %vm67_vm2, %v749_v11  ;;  %1651 = vmatpush3.bf16.msra.mxu0 %v1898_v1 }
 0xae8   :  { %1639 = vmatpush3.bf16.msra.mxu1 %v1941_v24  ;;  %1652 = vmatprep.subr.bf16.mxu0 %v1853_v0 }
 0xae9   :  { %1640 = vmatprep.subr.bf16.mxu1 %v1853_v0  ;;  %1646 = vmatprep.mubr.msk.bf16.mxu1 %vm1854_vm1, %v1853_v0 }
 0xaea   :  { %1654 = vmatprep.mubr.msk.bf16.mxu0 %vm1854_vm1, %v1853_v0 }
 0xaeb   :  { %1653 = vmatpush3.bf16.msra.mxu0 %v1917_v2 }
 0xaec   :  { %1641 = vmatpush3.bf16.msra.mxu1 %v1947_v25  ;;  %1658 = vmatprep.subr.bf16.mxu0 %v1853_v0 }
 0xaed   :  { %1642 = vmatprep.subr.bf16.mxu1 %v1853_v0 }
 0xaf0   :  { %1643 = vmatpush3.bf16.msra.mxu1 %v1955_v28 }
 0xaf1   :  { %1644 = vmatprep.subr.bf16.mxu1 %v1853_v0 }
 0xaf4   :  { %1645 = vmatpush3.bf16.msra.mxu1 %v1964_v29 }
 0xaf5   :  { %1670 = vmatprep.subr.bf16.mxu1 %v1853_v0 }
 0xba6   :  { %v713_v14 = vpop.f32.mrf.mxu0 }
 0xba7   :  { %v714_v15 = vadd.f32 %v1998_v46, %v713_v14  ;;  %v787_v16 = vpop.f32.mrf.mxu1 }
 0xba8   :  { %v793_v17 = vadd.f32 %v787_v16, %v745_v13  ;;  %v1628_v18 = vpop.f32.mrf.mxu0 }
 0xba9   :  { %1778 = vtanh.f32 %v714_v15  ;;  %v1636_v19 = vpop.f32.mrf.mxu1  ;;  %v1463_v30 = vmul.f32 -1.442695, %v714_v15 }
 0xbaa   :  { %1780 = vtanh.f32 %v793_v17  ;;  %v716_v20 = vpop.f32.mrf.mxu0  ;;  %v1466_v31 = vmul.f32 -1.442695, %v793_v17 }
 0xbab   :  { %v790_v21 = vpop.f32.mrf.mxu1  ;;  %1782 = vpow2.f32 %v1463_v30 }
 0xbac   :  { %v1629_v22 = vpop.f32.mrf.mxu0  ;;  %1784 = vpow2.f32 %v1466_v31 }
 0xbad   :  { %v1637_v26 = vpop.f32.mrf.mxu1 }
 0xbb6   :  { %v1779_v27 = vpop.eup %1778 }
 0xbb7   :  { %v1781_v23 = vpop.eup %1780  ;;  %728 = vrot.lane.b32.xlu0 %v1779_v27, %s1855_s26 }
 0xbb8   :  { %803 = vrot.lane.b32.xlu1 %v1781_v23, %s1855_s26  ;;  %v1783_v32 = vpop.eup %1782 }
 0xbb9   :  { %v1785_v33 = vpop.eup %1784  ;;  %v722_v34 = vadd.f32 1.0, %v1783_v32 }
 0xbba   :  { %v797_v36 = vadd.f32 1.0, %v1785_v33 }
 0xbbb   :  { %1786 = vrcp.f32 %v722_v34 }
 0xbbc   :  { %1788 = vrcp.f32 %v797_v36 }
 0xbc8   :  { %v1787_v37 = vpop.eup %1786 }
 0xbc9   :  { %v1789_v39 = vpop.eup %1788  ;;  %v726_v43 = vmul.f32 %v1787_v37, %v2089_v57 }
 0xbca   :  { %v801_v45 = vmul.f32 %v1789_v39, %v2091_v59 }
 0xc29   :  { %v729_v38 = vpop.permute.xlu0 %728 }
 0xc2a   :  { %v731_v40 = vmul.f32 %v1787_v37, %v729_v38  ;;  %v804_v41 = vpop.permute.xlu1 %803 }
 0xc2b   :  { %v806_v42 = vmul.f32 %v1789_v39, %v804_v41 }
 0xc2c   :  { %733 = vrot.lane.b32.xlu0 %v731_v40, %s1855_s26 }
 0xc2d   :  { %808 = vrot.lane.b32.xlu1 %v806_v42, %s1855_s26 }
 0xc9e   :  { %v734_v44 = vpop.permute.xlu0 %733 }
 0xc9f   :  { %v2130_v47 = vadd.f32 %v734_v44, %v726_v43  ;;  %v809_v48 = vpop.permute.xlu1 %808 }
 0xca0   :  { %v2132_v49 = vadd.f32 %v809_v48, %v801_v45 }
 0xca1   :  { %1790 = vtanh.f32 %v2130_v47 }
 0xca2   :  { %1792 = vtanh.f32 %v2132_v49 }
 0xcae   :  { %v1791_v50 = vpop.eup %1790 }
 0xcaf   :  { %v1793_v51 = vpop.eup %1792  ;;  %739 = vrot.lane.b32.xlu0 %v1791_v50, %s1855_s26 }
 0xcb0   :  { %814 = vrot.lane.b32.xlu1 %v1793_v51, %s1855_s26 }
 0xd21   :  { %v740_v52 = vpop.permute.xlu0 %739 }
 0xd22   :  { %v742_v53 = vmul.f32 %v1787_v37, %v740_v52  ;;  %v815_v54 = vpop.permute.xlu1 %814 }
 0xd23   :  { %v817_v55 = vmul.f32 %v1789_v39, %v815_v54 }
 0xd24   :  { %830 = vrot.lane.b32.xlu0 %v742_v53, %s1858_s16 }
 0xd25   :  { %v825_v56 = vrot.slane %v817_v55, %v1968_v35  ;;  %v905_v57 = vpack.c.bf16 %v817_v55, %v817_v55 }
 0xd27   :  { %826 = vrot.lane.b32.xlu1 %v825_v56, %s1857_s11 }
 0xd2b   :  { %907 = vrot.lane.b32.xlu1 %v905_v57, %s1857_s11 }
 0xd96   :  { %v831_v58 = vpop.permute.xlu0 %830 }
 0xd99   :  { %v827_v59 = vpop.permute.xlu1 %826 }
 0xd9a   :  { %v833_v60 = vsel %vm67_vm2, %v827_v59, %v831_v58 }
 0xd9b   :  { %v834_v61 = vpack.c.bf16 %v833_v60, %v833_v60 }
 0xd9d   :  { %1647 = vmatmul.mubr.msk.bf16.vlgmr.msra.gmra.mxu1 %vm194_vm3, %v834_v61  ;;  %v908_v62 = vpop.permute.xlu1 %907 }
 0xd9e   :  { %1655 = vmatmul.mubr.msk.bf16.vlgmr.msra.gmra.mxu0 %vm67_vm2, %v908_v62  ;;  %1671 = vmatpush3.bf16.msra.mxu1 %v1898_v1 }
 0xd9f   :  { %1659 = vmatpush3.bf16.msra.mxu0 %v1941_v24  ;;  %1672 = vmatprep.subr.bf16.mxu1 %v1853_v0 }
 0xda0   :  { %1660 = vmatprep.subr.bf16.mxu0 %v1853_v0  ;;  %1666 = vmatprep.mubr.msk.bf16.mxu0 %vm1854_vm1, %v1853_v0 }
 0xda1   :  { %1674 = vmatprep.mubr.msk.bf16.mxu1 %vm1854_vm1, %v1853_v0 }
 0xda2   :  { %1673 = vmatpush3.bf16.msra.mxu1 %v1917_v2 }
 0xda3   :  { %1661 = vmatpush3.bf16.msra.mxu0 %v1947_v25  ;;  %1678 = vmatprep.subr.bf16.mxu1 %v1853_v0 }
 0xda4   :  { %1662 = vmatprep.subr.bf16.mxu0 %v1853_v0 }
 0xda7   :  { %1663 = vmatpush3.bf16.msra.mxu0 %v1955_v28 }
 0xda8   :  { %1664 = vmatprep.subr.bf16.mxu0 %v1853_v0 }
 0xdab   :  { %1665 = vmatpush3.bf16.msra.mxu0 %v1964_v29 }
 0xdac   :  { %1690 = vmatprep.subr.bf16.mxu0 %v1853_v0 }
 0xe5d   :  { %v872_v4 = vpop.f32.mrf.mxu1 }
 0xe5e   :  { %v873_v5 = vadd.f32 %v1998_v46, %v872_v4  ;;  %v946_v6 = vpop.f32.mrf.mxu0 }
 0xe5f   :  { %v952_v7 = vadd.f32 %v946_v6, %v904_v3  ;;  %v1648_v8 = vpop.f32.mrf.mxu1 }
 0xe60   :  { %1794 = vtanh.f32 %v873_v5  ;;  %v1656_v9 = vpop.f32.mrf.mxu0  ;;  %v1468_v16 = vmul.f32 -1.442695, %v873_v5 }
 0xe61   :  { %1796 = vtanh.f32 %v952_v7  ;;  %v875_v10 = vpop.f32.mrf.mxu1  ;;  %v1471_v17 = vmul.f32 -1.442695, %v952_v7 }
 0xe62   :  { %v949_v11 = vpop.f32.mrf.mxu0  ;;  %1798 = vpow2.f32 %v1468_v16 }
 0xe63   :  { %v1649_v12 = vpop.f32.mrf.mxu1  ;;  %1800 = vpow2.f32 %v1471_v17 }
 0xe64   :  { %v1657_v13 = vpop.f32.mrf.mxu0 }
 0xe6d   :  { %v1795_v14 = vpop.eup %1794 }
 0xe6e   :  { %v1797_v15 = vpop.eup %1796  ;;  %887 = vrot.lane.b32.xlu1 %v1795_v14, %s1855_s26 }
 0xe6f   :  { %962 = vrot.lane.b32.xlu0 %v1797_v15, %s1855_s26  ;;  %v1799_v18 = vpop.eup %1798 }
 0xe70   :  { %v1801_v19 = vpop.eup %1800  ;;  %v881_v20 = vadd.f32 1.0, %v1799_v18 }
 0xe71   :  { %v956_v21 = vadd.f32 1.0, %v1801_v19 }
 0xe72   :  { %1802 = vrcp.f32 %v881_v20 }
 0xe73   :  { %1804 = vrcp.f32 %v956_v21 }
 0xe7f   :  { %v1803_v22 = vpop.eup %1802 }
 0xe80   :  { %v1805_v27 = vpop.eup %1804  ;;  %v885_v32 = vmul.f32 %v1803_v22, %v2130_v47 }
 0xe81   :  { %v960_v34 = vmul.f32 %v1805_v27, %v2132_v49 }
 0xee0   :  { %v888_v26 = vpop.permute.xlu1 %887 }
 0xee1   :  { %v890_v23 = vmul.f32 %v1803_v22, %v888_v26  ;;  %v963_v30 = vpop.permute.xlu0 %962 }
 0xee2   :  { %v965_v31 = vmul.f32 %v1805_v27, %v963_v30 }
 0xee3   :  { %892 = vrot.lane.b32.xlu1 %v890_v23, %s1855_s26 }
 0xee4   :  { %967 = vrot.lane.b32.xlu0 %v965_v31, %s1855_s26 }
 0xf55   :  { %v893_v33 = vpop.permute.xlu1 %892 }
 0xf56   :  { %v2171_v36 = vadd.f32 %v893_v33, %v885_v32  ;;  %v968_v37 = vpop.permute.xlu0 %967 }
 0xf57   :  { %v2173_v38 = vadd.f32 %v968_v37, %v960_v34 }
 0xf58   :  { %1806 = vtanh.f32 %v2171_v36 }
 0xf59   :  { %1808 = vtanh.f32 %v2173_v38 }
 0xf65   :  { %v1807_v39 = vpop.eup %1806 }
 0xf66   :  { %v1809_v40 = vpop.eup %1808  ;;  %898 = vrot.lane.b32.xlu1 %v1807_v39, %s1855_s26  ;;  %v1851_v39 = vld [vmem:[%s2284_s2 + $0x10] sm:$0xff]  }
 0xf67   :  { %973 = vrot.lane.b32.xlu0 %v1809_v40, %s1855_s26  ;;  %v1479_v40 = vld [vmem:[%s2283_s0 + $0x7] sm:$0x1] }
 0xfd8   :  { %v899_v41 = vpop.permute.xlu1 %898 }
 0xfd9   :  { %v901_v42 = vmul.f32 %v1803_v22, %v899_v41  ;;  %v974_v43 = vpop.permute.xlu0 %973  ;;  %v1222_v41 = vunpack.c.l.bf16 %v1479_v40 }
 0xfda   :  { %v976_v44 = vmul.f32 %v1805_v27, %v974_v43 }
 0xfdb   :  { %989 = vrot.lane.b32.xlu1 %v901_v42, %s1858_s16 }
 0xfdc   :  { %v984_v45 = vrot.slane %v976_v44, %v1968_v35  ;;  %v1064_v47 = vpack.c.bf16 %v976_v44, %v976_v44 }
 0xfde   :  { %985 = vrot.lane.b32.xlu0 %v984_v45, %s1857_s11 }
 0xfe2   :  { %1066 = vrot.lane.b32.xlu0 %v1064_v47, %s1857_s11 }
0x104d   :  { %v990_v48 = vpop.permute.xlu1 %989 }
0x1050   :  { %v986_v49 = vpop.permute.xlu0 %985 }
0x1051   :  { %v992_v50 = vsel %vm67_vm2, %v986_v49, %v990_v48 }
0x1052   :  { %v993_v51 = vpack.c.bf16 %v992_v50, %v992_v50 }
0x1054   :  { %v1067_v52 = vpop.permute.xlu0 %1066  ;;  %1667 = vmatmul.mubr.msk.bf16.vlgmr.msra.gmra.mxu0 %vm194_vm3, %v993_v51 }
0x1055   :  { %1675 = vmatmul.mubr.msk.bf16.vlgmr.msra.gmra.mxu1 %vm67_vm2, %v1067_v52  ;;  %1691 = vmatpush3.bf16.msra.mxu0 %v1898_v1  ;;  %v1474_v1 = vld [vmem:[%s2283_s0 + $0x6] sm:$0x1] }
0x1056   :  { %1679 = vmatpush3.bf16.msra.mxu1 %v1941_v24  ;;  %1692 = vmatprep.subr.bf16.mxu0 %v1853_v0  ;;  %v1063_v24 = vunpack.c.l.bf16 %v1474_v1 }
0x1057   :  { %1680 = vmatprep.subr.bf16.mxu1 %v1853_v0  ;;  %1686 = vmatprep.mubr.msk.bf16.mxu1 %vm1854_vm1, %v1853_v0 }
0x1058   :  { %1694 = vmatprep.mubr.msk.bf16.mxu0 %vm1854_vm1, %v1853_v0 }
0x1059   :  { %1693 = vmatpush3.bf16.msra.mxu0 %v1917_v2 }
0x105a   :  { %1681 = vmatpush3.bf16.msra.mxu1 %v1947_v25  ;;  %1698 = vmatprep.subr.bf16.mxu0 %v1853_v0 }
0x105b   :  { %1682 = vmatprep.subr.bf16.mxu1 %v1853_v0 }
0x105e   :  { %1683 = vmatpush3.bf16.msra.mxu1 %v1955_v28 }
0x105f   :  { %1684 = vmatprep.subr.bf16.mxu1 %v1853_v0 }
0x1062   :  { %1685 = vmatpush3.bf16.msra.mxu1 %v1964_v29 }
0x1114   :  { %v1031_v53 = vpop.f32.mrf.mxu0 }
0x1115   :  { %v1032_v2 = vadd.f32 %v1998_v46, %v1031_v53  ;;  %v1105_v54 = vpop.f32.mrf.mxu1 }
0x1116   :  { %v1111_v25 = vadd.f32 %v1105_v54, %v1063_v24  ;;  %v1668_v55 = vpop.f32.mrf.mxu0 }
0x1117   :  { %1810 = vtanh.f32 %v1032_v2  ;;  %v1676_v56 = vpop.f32.mrf.mxu1  ;;  %v1473_v63 = vmul.f32 -1.442695, %v1032_v2 }
0x1118   :  { %1812 = vtanh.f32 %v1111_v25  ;;  %v1034_v57 = vpop.f32.mrf.mxu0  ;;  %v1476_v3 = vmul.f32 -1.442695, %v1111_v25 }
0x1119   :  { %v1108_v58 = vpop.f32.mrf.mxu1  ;;  %1814 = vpow2.f32 %v1473_v63 }
0x111a   :  { %v1669_v59 = vpop.f32.mrf.mxu0  ;;  %1816 = vpow2.f32 %v1476_v3 }
0x111b   :  { %v1677_v60 = vpop.f32.mrf.mxu1 }
0x1124   :  { %v1811_v61 = vpop.eup %1810 }
0x1125   :  { %v1813_v62 = vpop.eup %1812  ;;  %1046 = vrot.lane.b32.xlu0 %v1811_v61, %s1855_s26 }
0x1126   :  { %1121 = vrot.lane.b32.xlu1 %v1813_v62, %s1855_s26  ;;  %v1815_v4 = vpop.eup %1814 }
0x1127   :  { %v1817_v5 = vpop.eup %1816  ;;  %v1040_v6 = vadd.f32 1.0, %v1815_v4 }
0x1128   :  { %v1115_v7 = vadd.f32 1.0, %v1817_v5 }
0x1129   :  { %1818 = vrcp.f32 %v1040_v6 }
0x112a   :  { %1820 = vrcp.f32 %v1115_v7 }
0x1136   :  { %v1819_v8 = vpop.eup %1818 }
0x1137   :  { %v1821_v10 = vpop.eup %1820  ;;  %v1044_v14 = vmul.f32 %v1819_v8, %v2171_v36 }
0x1138   :  { %v1119_v16 = vmul.f32 %v1821_v10, %v2173_v38  ;;  %v1850_v38 = vld [vmem:[%s2284_s2 + $0x18] sm:$0xff]  }
0x1197   :  { %v1047_v9 = vpop.permute.xlu0 %1046 }
0x1198   :  { %v1049_v11 = vmul.f32 %v1819_v8, %v1047_v9  ;;  %v1122_v12 = vpop.permute.xlu1 %1121 }
0x1199   :  { %v1124_v13 = vmul.f32 %v1821_v10, %v1122_v12 }
0x119a   :  { %1051 = vrot.lane.b32.xlu0 %v1049_v11, %s1855_s26 }
0x119b   :  { %1126 = vrot.lane.b32.xlu1 %v1124_v13, %s1855_s26 }
0x120c   :  { %v1052_v15 = vpop.permute.xlu0 %1051 }
0x120d   :  { %v2211_v17 = vadd.f32 %v1052_v15, %v1044_v14  ;;  %v1127_v18 = vpop.permute.xlu1 %1126 }
0x120e   :  { %v2213_v19 = vadd.f32 %v1127_v18, %v1119_v16  ;;  %v1852_v16 = vld [vmem:[%s2285_s3] ss:$0 sm:$0xff] }
0x120f   :  { %1822 = vtanh.f32 %v2211_v17 }
0x1210   :  { %1824 = vtanh.f32 %v2213_v19 }
0x121c   :  { %v1823_v20 = vpop.eup %1822 }
0x121d   :  { %v1825_v21 = vpop.eup %1824  ;;  %1057 = vrot.lane.b32.xlu0 %v1823_v20, %s1855_s26 }
0x121e   :  { %1132 = vrot.lane.b32.xlu1 %v1825_v21, %s1855_s26 }
0x128f   :  { %v1058_v22 = vpop.permute.xlu0 %1057 }
0x1290   :  { %v1060_v26 = vmul.f32 %v1819_v8, %v1058_v22  ;;  %v1133_v27 = vpop.permute.xlu1 %1132 }
0x1291   :  { %v1135_v23 = vmul.f32 %v1821_v10, %v1133_v27 }
0x1292   :  { %1148 = vrot.lane.b32.xlu0 %v1060_v26, %s1858_s16 }
0x1293   :  { %v1143_v30 = vrot.slane %v1135_v23, %v1968_v35  ;;  %v1223_v31 = vpack.c.bf16 %v1135_v23, %v1135_v23 }
0x1295   :  { %1144 = vrot.lane.b32.xlu1 %v1143_v30, %s1857_s11 }
0x1299   :  { %1225 = vrot.lane.b32.xlu1 %v1223_v31, %s1857_s11 }
0x1304   :  { %v1149_v32 = vpop.permute.xlu0 %1148 }
0x1307   :  { %v1145_v33 = vpop.permute.xlu1 %1144 }
0x1308   :  { %v1151_v34 = vsel %vm67_vm2, %v1145_v33, %v1149_v32  ;;  %v1484_v32 = vld [vmem:[%s2286_s4] ss:$0 sm:$0xff] }
0x1309   :  { %v1152_v36 = vpack.c.bf16 %v1151_v34, %v1151_v34 }
0x130b   :  { %1687 = vmatmul.mubr.msk.bf16.vlgmr.msra.gmra.mxu1 %vm194_vm3, %v1152_v36  ;;  %v1226_v37 = vpop.permute.xlu1 %1225 }
0x130c   :  { %1695 = vmatmul.mubr.msk.bf16.vlgmr.msra.gmra.mxu0 %vm67_vm2, %v1226_v37 }
0x130d   :  { %1699 = vmatpush3.bf16.msra.mxu0 %v1850_v38  ;;  %1706 = vmatprep.mubr.msk.bf16.mxu0 %vm1854_vm1, %v1853_v0 }
0x130e   :  { %1700 = vmatprep.subr.bf16.mxu0 %v1853_v0 }
0x1311   :  { %1701 = vmatpush3.bf16.msra.mxu0 %v1851_v39 }
0x1312   :  { %1702 = vmatprep.subr.bf16.mxu0 %v1853_v0 }
0x1315   :  { %1703 = vmatpush3.bf16.msra.mxu0 %v1955_v28 }
0x1316   :  { %1704 = vmatprep.subr.bf16.mxu0 %v1853_v0 }
0x1319   :  { %1705 = vmatpush3.bf16.msra.mxu0 %v1964_v29 }
0x13cb   :  { %v1190_v42 = vpop.f32.mrf.mxu1 }
0x13cc   :  { %v1191_v43 = vadd.f32 %v1998_v46, %v1190_v42  ;;  %v1264_v44 = vpop.f32.mrf.mxu0  ;;  %v11_v42 = vstv %s2287_s5 }
0x13cd   :  { %v1270_v45 = vadd.f32 %v1264_v44, %v1222_v41  ;;  %v1688_v47 = vpop.f32.mrf.mxu1  ;;  %12 = vst [vmem:[#allocation6] sm:$0x1] %v11_v42 }
0x13ce   :  { %1826 = vtanh.f32 %v1191_v43  ;;  %v1696_v48 = vpop.f32.mrf.mxu0  ;;  %v1478_v52 = vmul.f32 -1.442695, %v1191_v43 }
0x13cf   :  { %1828 = vtanh.f32 %v1270_v45  ;;  %v1193_v49 = vpop.f32.mrf.mxu1  ;;  %v1481_v1 = vmul.f32 -1.442695, %v1270_v45 }
0x13d0   :  { %v1267_v28 = vpop.f32.mrf.mxu0  ;;  %1830 = vpow2.f32 %v1478_v52 }
0x13d1   :  { %v1689_v50 = vpop.f32.mrf.mxu1  ;;  %1832 = vpow2.f32 %v1481_v1 }
0x13d2   :  { %v1697_v0 = vpop.f32.mrf.mxu0 }
0x13db   :  { %v1827_v51 = vpop.eup %1826 }
0x13dc   :  { %v1829_v29 = vpop.eup %1828  ;;  %1205 = vrot.lane.b32.xlu1 %v1827_v51, %s1855_s26 }
0x13dd   :  { %1280 = vrot.lane.b32.xlu0 %v1829_v29, %s1855_s26  ;;  %v1831_v46 = vpop.eup %1830 }
0x13de   :  { %v1833_v24 = vpop.eup %1832  ;;  %v1199_v53 = vadd.f32 1.0, %v1831_v46 }
0x13df   :  { %v1274_v2 = vadd.f32 1.0, %v1833_v24 }
0x13e0   :  { %1834 = vrcp.f32 %v1199_v53 }
0x13e1   :  { %1836 = vrcp.f32 %v1274_v2 }
0x13ed   :  { %v1835_v54 = vpop.eup %1834 }
0x13ee   :  { %v1837_v55 = vpop.eup %1836  ;;  %v1203_v59 = vmul.f32 %v1835_v54, %v2211_v17 }
0x13ef   :  { %v1278_v61 = vmul.f32 %v1837_v55, %v2213_v19 }
0x144e   :  { %v1206_v25 = vpop.permute.xlu1 %1205 }
0x144f   :  { %v1208_v56 = vmul.f32 %v1835_v54, %v1206_v25  ;;  %v1281_v57 = vpop.permute.xlu0 %1280 }
0x1450   :  { %v1283_v58 = vmul.f32 %v1837_v55, %v1281_v57 }
0x1451   :  { %1210 = vrot.lane.b32.xlu1 %v1208_v56, %s1855_s26 }
0x1452   :  { %1285 = vrot.lane.b32.xlu0 %v1283_v58, %s1855_s26 }
0x14c3   :  { %v1211_v60 = vpop.permute.xlu1 %1210 }
0x14c4   :  { %v1213_v62 = vadd.f32 %v1211_v60, %v1203_v59  ;;  %v1286_v63 = vpop.permute.xlu0 %1285 }
0x14c5   :  { %v1288_v3 = vadd.f32 %v1286_v63, %v1278_v61 }
0x14c6   :  { %1838 = vtanh.f32 %v1213_v62 }
0x14c7   :  { %1840 = vtanh.f32 %v1288_v3  ;;  %v1388_v43 = vrot.slane %v1288_v3, %v1968_v35 }
0x14d3   :  { %v1839_v4 = vpop.eup %1838 }
0x14d4   :  { %v1841_v5 = vpop.eup %1840  ;;  %1216 = vrot.lane.b32.xlu1 %v1839_v4, %s1855_s26 }
0x14d5   :  { %1291 = vrot.lane.b32.xlu0 %v1841_v5, %s1855_s26 }
0x1546   :  { %v1217_v6 = vpop.permute.xlu1 %1216 }
0x1547   :  { %v1219_v7 = vmul.f32 %v1835_v54, %v1217_v6  ;;  %v1292_v8 = vpop.permute.xlu0 %1291 }
0x1548   :  { %v1294_v9 = vmul.f32 %v1837_v55, %v1292_v8 }
0x1549   :  { %1307 = vrot.lane.b32.xlu1 %v1219_v7, %s1858_s16 }
0x154a   :  { %v1302_v10 = vrot.slane %v1294_v9, %v1968_v35  ;;  %v1485_v35 = vld [vmem:[#allocation6] ss:$0 sm:$0xff] }
0x154c   :  { %1303 = vrot.lane.b32.xlu0 %v1302_v10, %s1857_s11 }
0x15bb   :  { %v1308_v11 = vpop.permute.xlu1 %1307 }
0x15be   :  { %v1304_v12 = vpop.permute.xlu0 %1303 }
0x15bf   :  { %v1310_v13 = vsel %vm67_vm2, %v1304_v12, %v1308_v11  ;;  %1380 = vst.msk [vmem:[#allocation2] sm:$0x3] %vm30_vm0, %v1304_v12 }
0x15c0   :  { %v1311_v14 = vpack.c.bf16 %v1310_v13, %v1310_v13 }
0x15c2   :  { %1707 = vmatmul.mubr.msk.bf16.vlgmr.msra.gmra.mxu0 %vm194_vm3, %v1311_v14 }
0x1682   :  { %v1349_v15 = vpop.f32.mrf.mxu0 }
0x1683   :  { %v1350_v17 = vadd.f32 %v1852_v16, %v1349_v15 }
0x1684   :  { %v1708_v18 = vpop.f32.mrf.mxu0 }
0x1685   :  { %1842 = vtanh.f32 %v1350_v17  ;;  %v1483_v22 = vmul.f32 -1.442695, %v1350_v17 }
0x1686   :  { %v1352_v19 = vpop.f32.mrf.mxu0 }
0x1687   :  { %1844 = vpow2.f32 %v1483_v22 }
0x1688   :  { %v1709_v20 = vpop.f32.mrf.mxu0 }
0x1692   :  { %v1843_v21 = vpop.eup %1842 }
0x1693   :  { %1364 = vrot.lane.b32.xlu0 %v1843_v21, %s1855_s26 }
0x1694   :  { %v1845_v26 = vpop.eup %1844 }
0x1695   :  { %v1358_v27 = vadd.f32 1.0, %v1845_v26 }
0x1697   :  { %1846 = vrcp.f32 %v1358_v27 }
0x16a4   :  { %v1847_v23 = vpop.eup %1846 }
0x16a5   :  { %v1362_v33 = vmul.f32 %v1847_v23, %v1213_v62 }
0x1705   :  { %v1365_v30 = vpop.permute.xlu0 %1364 }
0x1706   :  { %v1367_v31 = vmul.f32 %v1847_v23, %v1365_v30 }
0x1708   :  { %1369 = vrot.lane.b32.xlu1 %v1367_v31, %s1855_s26 }
0x170c   :  { %1412 = vrot.lane.b32.xlu1 %v1484_v32, %s1857_s11 }
0x177a   :  { %v1370_v34 = vpop.permute.xlu1 %1369 }
0x177b   :  { %v1372_v36 = vadd.f32 %v1370_v34, %v1362_v33 }
0x177d   :  { %1848 = vtanh.f32 %v1372_v36 }
0x177e   :  { %v1413_v39 = vpop.permute.xlu1 %1412 }
0x178a   :  { %v1849_v37 = vpop.eup %1848 }
0x178b   :  { %1375 = vrot.lane.b32.xlu0 %v1849_v37, %s1855_s26 }
0x17fd   :  { %v1376_v38 = vpop.permute.xlu0 %1375 }
0x17fe   :  { %v1378_v40 = vmul.f32 %v1847_v23, %v1376_v38 }
0x1800   :  { %v1415_v41 = vmul.f32 %v1413_v39, %v1378_v40 }
0x1802   :  { %1417 = vrot.lane.b32.xlu0 %v1415_v41, %s1857_s11 }
0x1806   :  { %1389 = vrot.lane.b32.xlu0 %v1388_v43, %s1858_s16 }
0x180a   :  { %1394 = vrot.lane.b32.xlu0 %v1378_v40, %s1857_s11 }
0x180e   :  { %1399 = vrot.lane.b32.xlu0 %v1372_v36, %s1858_s16 }
0x1874   :  { %v1418_v44 = vpop.permute.xlu0 %1417 }
0x1875   :  { %v1420_v45 = vsel %vm30_vm0, %v1418_v44, 0.0 }
0x1876   :  { %1421 = vadd.xlane.f32.xlu1 %v1420_v45 }
0x1878   :  { %v1390_v47 = vpop.permute.xlu0 %1389 }
0x1879   :  { %1392 = vst.msk [vmem:[#allocation3] sm:$0x3] %vm30_vm0, %v1390_v47 }
0x187c   :  { %v1395_v48 = vpop.permute.xlu0 %1394 }
0x187d   :  { %1397 = vst.msk [vmem:[#allocation4] sm:$0x3] %vm30_vm0, %v1395_v48 }
0x1880   :  { %v1400_v49 = vpop.permute.xlu0 %1399 }
0x1881   :  { %1402 = vst.msk [vmem:[#allocation5] sm:$0x3] %vm30_vm0, %v1400_v49 }
0x18ff   :  { %v1422_v28 = vpop.xlane.xlu1 %1421 }
0x1900   :  { %v1430_v50 = vadd.f32 %v1485_v35, %v1422_v28 }
0x1902   :  { %1432 = vst.msk [vmem:[%s2288_s6] sm:$0x3] %vm1431_vm4, %v1430_v50 }

</bundles_post_ra>
